<compile_context>
chip_gen: v7x
topology: tpu7x:2x2x1
jax: 0.10.0
libtpu: 0.0.40
codegen_flags: <defaults>
</compile_context>

<pallas_src>
import functools

import jax
import jax.numpy as jnp
import numpy as np
from jax.experimental import pallas as pl
from jax.experimental.pallas import tpu as pltpu

# 4th-order FD Laplacian coefficients (per dimension): c0, c1, c2
_C0 = -2.5
_C1 = 4.0 / 3.0
_C2 = -1.0 / 12.0


def _round_up(x, m):
    return ((x + m - 1) // m) * m


def _laplacian_interior(u, ny, nx, h):
    """Order-4 Laplacian of padded wavefield u (ny+4, nx+4) -> interior (ny, nx).

    Used only by the pure-JAX reference.
    """
    c = u[2:2 + ny, 2:2 + nx]
    lap = (2.0 * _C0) * c
    lap = lap + _C1 * (u[3:3 + ny, 2:2 + nx] + u[1:1 + ny, 2:2 + nx]
                       + u[2:2 + ny, 3:3 + nx] + u[2:2 + ny, 1:1 + nx])
    lap = lap + _C2 * (u[4:4 + ny, 2:2 + nx] + u[0:ny, 2:2 + nx]
                       + u[2:2 + ny, 4:4 + nx] + u[2:2 + ny, 0:nx])
    return lap * (1.0 / (h * h))


def _time2d_kernel(ny_c, xp, tt, h,
                   sx_ref, sy_ref, ry_ref,      # scalar prefetch (SMEM)
                   a_ref, wav_ref,              # inputs: coeff (VMEM), wavelet (SMEM)
                   seis_ref,                    # output block (1, tt, xp)
                   u0, u1):                     # VMEM ping-pong wavefields
    s = pl.program_id(0)
    chunk = pl.program_id(1)
    sx = sx_ref[s]
    sy = sy_ref[s]
    ry = ry_ref[0]

    # Fresh wavefields at the first time chunk of each shot (scratch persists
    # across the inner "arbitrary" time-chunk axis; chunk index resets per shot).
    @pl.when(chunk == 0)
    def _():
        u0[...] = jnp.zeros_like(u0)
        u1[...] = jnp.zeros_like(u1)

    # Point-source injection vector: v2dt2[sy, :] * onehot(sx) = a[sy,:]*h^2*onehot(sx).
    lane = jax.lax.broadcasted_iota(jnp.int32, (1, xp), 1)
    inj_row = jnp.where(lane == sx,
                        a_ref[pl.ds(sy, 1), :] * (h * h),
                        0.0).astype(jnp.float32)

    c0x2 = 2.0 * _C0
    t_base = chunk * tt

    def fd_step(t, cur_ref, nxt_ref):
        """One leapfrog step: nxt_ref (holding u_{t-1}) is overwritten with u_{t+1}.

        Returns the receiver line of the just-updated field.
        """
        c = cur_ref[...]                                  # aligned full-tile load
        # All 8 stencil neighbours via XLU rotations of the aligned tile.
        # Wrapped values only travel through the guaranteed-zero padding rows
        # (ny_c >= ny+2) / cols (xp >= nx+2), so the Dirichlet-zero halo is
        # preserved with no masking and no misaligned sublane loads.
        ym1 = pltpu.roll(c, shift=1, axis=0)
        yp1 = pltpu.roll(c, shift=ny_c - 1, axis=0)
        ym2 = pltpu.roll(c, shift=2, axis=0)
        yp2 = pltpu.roll(c, shift=ny_c - 2, axis=0)
        xm1 = pltpu.roll(c, shift=1, axis=1)
        xp1 = pltpu.roll(c, shift=xp - 1, axis=1)
        xm2 = pltpu.roll(c, shift=2, axis=1)
        xp2 = pltpu.roll(c, shift=xp - 2, axis=1)

        lap = (c0x2 * c
               + _C1 * ((ym1 + yp1) + (xm1 + xp1))
               + _C2 * ((ym2 + yp2) + (xm2 + xp2)))

        up = nxt_ref[...]
        unew = (2.0 * c - up) + a_ref[...] * lap
        nxt_ref[...] = unew                               # aligned, unmasked store

        # Point-source injection: one-row read-modify-write.
        row = nxt_ref[pl.ds(sy, 1), :]
        nxt_ref[pl.ds(sy, 1), :] = row + wav_ref[t] * inj_row

        # Receiver line (depth ry, all x) of the just-updated field.
        return nxt_ref[pl.ds(ry, 1), :]

    n_groups = tt // 8
    bufs = (u0, u1)

    def group(g, carry):
        lt0 = pl.multiple_of(g * 8, 8)   # within-chunk output row offset
        t0 = t_base + lt0                # global time index of the first step
        rows = []
        for k in range(8):               # statically unrolled leapfrog octet
            rows.append(fd_step(t0 + k, bufs[k & 1], bufs[1 - (k & 1)]))
        # One aligned, unmasked (8, xp) store per 8 time steps.
        seis_ref[0, pl.ds(lt0, 8), :] = jnp.concatenate(rows, axis=0)
        return carry

    jax.lax.fori_loop(0, n_groups, group, 0)


def time_inv_forward(vparam, w, sx, sy, ry, *, h, dt, vmin, vmax):
    """Pallas forward: returns seismogram (nshots, nt, nx), float32."""
    ny, nx = vparam.shape
    nt = int(w.shape[0])
    nshots = int(sx.shape[0])

    # >= 2 guaranteed-zero rows below and >= 2 zero cols right of the physical
    # grid so the sublane/lane rolls wrap through Dirichlet-zero halo values.
    ny_c = _round_up(ny + 2, 8)
    xp = _round_up(nx + 2, 128)

    # Time chunking: stream the seismogram in (1, tt, xp) blocks.  tt is a
    # multiple of 8 (even -> leapfrog buffer roles are preserved across chunks);
    # nt is padded up to a multiple of tt (extra zero-source steps are sliced off).
    nt8 = _round_up(nt, 8)
    if nt8 <= 512:
        tt = nt8
    else:
        best = (nt8 + 1, 512)
        for cand in range(512, 63, -8):
            waste = _round_up(nt8, cand) - nt8
            if waste < best[0]:
                best = (waste, cand)
            if waste == 0:
                break
        tt = best[1]
    nt_pad = _round_up(nt8, tt)
    n_chunks = nt_pad // tt

    # Precomputed stencil coefficient a = (clip(v)*dt/h)^2 (shot-invariant), zero
    # in the padding -> the padded rows/cols self-maintain as zeros
    # (unew = 2*0 - 0 + 0*lap), giving the Dirichlet-zero halo for free.
    a_pad = jnp.zeros((ny_c, xp), jnp.float32).at[:ny, :nx].set(
        (jnp.clip(vparam.astype(jnp.float32), vmin, vmax) * (dt / h)) ** 2)

    w_pad = jnp.zeros((nt_pad,), jnp.float32).at[:nt].set(w.astype(jnp.float32))

    kernel = functools.partial(_time2d_kernel, ny_c, xp, tt, float(h))

    grid_spec = pltpu.PrefetchScalarGridSpec(
        num_scalar_prefetch=3,                  # sx, sy, ry -> SMEM
        grid=(nshots, n_chunks),                # shots outer (parallel), time inner
        in_specs=[
            pl.BlockSpec((ny_c, xp), lambda s, c, sxr, syr, ryr: (0, 0)),   # coeff a
            pl.BlockSpec(memory_space=pltpu.MemorySpace.SMEM),              # wavelet
        ],
        out_specs=pl.BlockSpec((1, tt, xp), lambda s, c, sxr, syr, ryr: (s, c, 0)),
        scratch_shapes=[
            pltpu.VMEM((ny_c, xp), jnp.float32),   # ping-pong wavefield A
            pltpu.VMEM((ny_c, xp), jnp.float32),   # ping-pong wavefield B
        ],
    )

    # VMEM budget: state (2) + double-buffered coefficient (2) + double-buffered
    # output chunk (2) + conservative allowance for the stencil temporaries.
    # Capped at 56 MiB so it stays inside v7x's 64 MiB/TC (fine on v5e/v6e too).
    field = ny_c * xp * 4
    out_blk = tt * xp * 4
    est = 4 * field + 2 * out_blk + 14 * field
    vmem_limit = max(16 << 20, min(int(est * 1.25) + (2 << 20), 56 << 20))

    out = pl.pallas_call(
        kernel,
        out_shape=jax.ShapeDtypeStruct((nshots, nt_pad, xp), jnp.float32),
        grid_spec=grid_spec,
        compiler_params=pltpu.CompilerParams(
            # Shots are independent; keep nshots a multiple of 2 per call to
            # fill both v7x TensorCores.
            dimension_semantics=("parallel", "arbitrary"),
            vmem_limit_bytes=vmem_limit,
        ),
    )(sx.astype(jnp.int32), sy.astype(jnp.int32), ry.astype(jnp.int32),
      a_pad, w_pad)

    return out[:, :nt, :nx]


def reference_forward(vparam, w, sx, sy, ry, *, h, dt, vmin, vmax):
    """Pure-JAX reference with identical semantics (independent formulation)."""
    ny, nx = vparam.shape
    nt = w.shape[0]
    v = jnp.clip(vparam, vmin, vmax)
    v2dt2 = (v * dt) ** 2

    def one_shot(sxi, syi):
        iy = jax.lax.broadcasted_iota(jnp.int32, (ny, nx), 0)
        ix = jax.lax.broadcasted_iota(jnp.int32, (ny, nx), 1)
        mask = jnp.where((iy == syi) & (ix == sxi), 1.0, 0.0).astype(jnp.float32)
        ucur0 = jnp.zeros((ny + 4, nx + 4), jnp.float32)
        uprev0 = jnp.zeros((ny + 4, nx + 4), jnp.float32)
        seis0 = jnp.zeros((nt, nx), jnp.float32)

        def step(t, carry):
            ucur, uprev, seis = carry
            lap = _laplacian_interior(ucur, ny, nx, h)
            src = w[t] * mask
            unew = (2.0 * ucur[2:2 + ny, 2:2 + nx]
                    - uprev[2:2 + ny, 2:2 + nx]
                    + v2dt2 * (lap + src))
            unew_pad = jnp.zeros_like(ucur).at[2:2 + ny, 2:2 + nx].set(unew)
            rec = jax.lax.dynamic_slice(unew_pad, (ry[0] + 2, 2), (1, nx))
            seis = jax.lax.dynamic_update_slice(seis, rec, (t, 0))
            return (unew_pad, ucur, seis)

        _, _, seis = jax.lax.fori_loop(0, nt, step, (ucur0, uprev0, seis0))
        return seis

    return jax.vmap(one_shot)(sx, sy)


if __name__ == "__main__":
    # Small, deterministic problem.
    NY, NX = 16, 16          # velocity grid (depth, lateral)
    NT = 8                   # time steps
    NSHOTS = 2
    H = 0.05                 # grid spacing (km)
    DT = 0.004               # time step (s) -> CFL: vmax*dt/h = 0.44
    VMIN, VMAX = 1.5, 5.5
    FREQ, T0 = 25.0, 0.012

    key = jax.random.PRNGKey(0)
    k_v, = jax.random.split(key, 1)
    vparam = (2.0 + 2.0 * jax.random.uniform(k_v, (NY, NX))).astype(jnp.float32)

    # Deterministic Ricker wavelet.
    t = np.arange(NT, dtype=np.float32) * DT
    arg = (np.pi * FREQ * (t - T0)) ** 2
    w = jnp.asarray(((1.0 - 2.0 * arg) * np.exp(-arg)).astype(np.float32))

    sx = jnp.array([4, 11], dtype=jnp.int32)   # source x index per shot
    sy = jnp.array([2, 3], dtype=jnp.int32)    # source y (depth) index per shot
    ry = jnp.array([1], dtype=jnp.int32)       # receiver depth index (line of receivers)

    out = time_inv_forward(vparam, w, sx, sy, ry, h=H, dt=DT, vmin=VMIN, vmax=VMAX)
    out = jax.block_until_ready(out)

    ref = jax.block_until_ready(
        reference_forward(vparam, w, sx, sy, ry, h=H, dt=DT, vmin=VMIN, vmax=VMAX))

    assert out.shape == (NSHOTS, NT, NX) and out.dtype == jnp.float32
    assert jnp.allclose(out, ref, rtol=1e-3, atol=1e-6), "mismatch vs pure-JAX reference"
    print("KERNEL_OK")
</pallas_src>

<mosaic_0001>
module attributes {stable_mosaic.version = 11 : i64} {
  func.func @_time2d_kernel(%arg0: i32, %arg1: i32, %arg2: memref<2xi32, #tpu.memory_space<smem>>, %arg3: memref<2xi32, #tpu.memory_space<smem>>, %arg4: memref<1xi32, #tpu.memory_space<smem>>, %arg5: memref<24x128xf32, #tpu.memory_space<vmem>>, %arg6: memref<8xf32, #tpu.memory_space<smem>>, %arg7: memref<1x8x128xf32, #tpu.memory_space<vmem>>, %arg8: memref<24x128xf32, #tpu.memory_space<vmem>>, %arg9: memref<24x128xf32, #tpu.memory_space<vmem>>) attributes {dimension_semantics = [#tpu.dimension_semantics<parallel>, #tpu.dimension_semantics<arbitrary>], iteration_bounds = array<i64: 2, 1>, scalar_prefetch = 3 : i64, scratch_operands = 2 : i64, tpu.core_type = #tpu.core_type<tc>, window_params = [{pipeline_mode = #tpu.pipeline_mode<synchronous>, transform_indices = @transform_0, window_bounds = array<i64: 24, 128>}, {transform_indices = @transform_1, window_bounds = array<i64: 8>}, {transform_indices = @transform_2, window_bounds = array<i64: 1, 8, 128>}]} {
    %0 = arith.index_cast %arg0 : i32 to index
    %1 = memref.load %arg2[%0] : memref<2xi32, #tpu.memory_space<smem>>
    %2 = arith.index_cast %arg0 : i32 to index
    %3 = memref.load %arg3[%2] : memref<2xi32, #tpu.memory_space<smem>>
    %c0 = arith.constant 0 : index
    %4 = memref.load %arg4[%c0] : memref<1xi32, #tpu.memory_space<smem>>
    %c0_i32 = arith.constant 0 : i32
    %5 = arith.cmpi eq, %arg1, %c0_i32 : i32
    %6 = arith.extui %5 : i1 to i32
    %c0_i32_0 = arith.constant 0 : i32
    %7 = arith.cmpi ne, %6, %c0_i32_0 : i32
    scf.if %7 {
      %cst_189 = arith.constant 0.000000e+00 : f32
      %370 = vector.broadcast %cst_189 : f32 to vector<24x128xf32>
      %c0_190 = arith.constant 0 : index
      %c0_191 = arith.constant 0 : index
      %371 = vector.load %arg8[%c0_190, %c0_191] : memref<24x128xf32, #tpu.memory_space<vmem>>, vector<24x128xf32>
      tpu.vector_store %arg8[%c0_190, %c0_191], %370 {strides = array<i32>} : memref<24x128xf32, #tpu.memory_space<vmem>>, vector<24x128xf32>,
      %cst_192 = arith.constant 0.000000e+00 : f32
      %372 = vector.broadcast %cst_192 : f32 to vector<24x128xf32>
      %c0_193 = arith.constant 0 : index
      %c0_194 = arith.constant 0 : index
      %373 = vector.load %arg9[%c0_193, %c0_194] : memref<24x128xf32, #tpu.memory_space<vmem>>, vector<24x128xf32>
      tpu.vector_store %arg9[%c0_193, %c0_194], %372 {strides = array<i32>} : memref<24x128xf32, #tpu.memory_space<vmem>>, vector<24x128xf32>,
    } else {
    }
    %8 = tpu.iota {dimensions = array<i32: 1>} : vector<1x128xi32>
    %9 = vector.broadcast %1 : i32 to vector<1x128xi32>
    %10 = arith.cmpi eq, %8, %9 : vector<1x128xi32>
    %11 = arith.index_cast %3 : i32 to index
    %c0_1 = arith.constant 0 : index
    %12 = vector.load %arg5[%11, %c0_1] : memref<24x128xf32, #tpu.memory_space<vmem>>, vector<1x128xf32>
    %cst = arith.constant 2.500000e-03 : f32
    %13 = vector.broadcast %cst : f32 to vector<1x128xf32>
    %14 = arith.mulf %12, %13 : vector<1x128xf32>
    %cst_2 = arith.constant 0.000000e+00 : f32
    %15 = vector.broadcast %cst_2 : f32 to vector<1x128xf32>
    %16 = arith.select %10, %14, %15 : vector<1x128xi1>, vector<1x128xf32>
    %c8_i32 = arith.constant 8 : i32
    %17 = arith.muli %arg1, %c8_i32 : i32
    %c0_i32_3 = arith.constant 0 : i32
    %c8_i32_4 = arith.constant 8 : i32
    %18 = arith.muli %c0_i32_3, %c8_i32_4 : i32
    %19 = tpu.assume_multiple %18, 8 : i32
    %20 = arith.addi %17, %19 : i32
    %c0_i32_5 = arith.constant 0 : i32
    %21 = arith.addi %20, %c0_i32_5 : i32
    %c0_6 = arith.constant 0 : index
    %c0_7 = arith.constant 0 : index
    %22 = vector.load %arg8[%c0_6, %c0_7] : memref<24x128xf32, #tpu.memory_space<vmem>>, vector<24x128xf32>
    %c1_i32 = arith.constant 1 : i32
    %23 = tpu.dynamic_rotate %22 by %c1_i32 dim 0 : vector<24x128xf32>, i32 -> vector<24x128xf32>
    %c23_i32 = arith.constant 23 : i32
    %24 = tpu.dynamic_rotate %22 by %c23_i32 dim 0 : vector<24x128xf32>, i32 -> vector<24x128xf32>
    %c2_i32 = arith.constant 2 : i32
    %25 = tpu.dynamic_rotate %22 by %c2_i32 dim 0 : vector<24x128xf32>, i32 -> vector<24x128xf32>
    %c22_i32 = arith.constant 22 : i32
    %26 = tpu.dynamic_rotate %22 by %c22_i32 dim 0 : vector<24x128xf32>, i32 -> vector<24x128xf32>
    %c1_i32_8 = arith.constant 1 : i32
    %27 = tpu.dynamic_rotate %22 by %c1_i32_8 dim 1 : vector<24x128xf32>, i32 -> vector<24x128xf32>
    %c127_i32 = arith.constant 127 : i32
    %28 = tpu.dynamic_rotate %22 by %c127_i32 dim 1 : vector<24x128xf32>, i32 -> vector<24x128xf32>
    %c2_i32_9 = arith.constant 2 : i32
    %29 = tpu.dynamic_rotate %22 by %c2_i32_9 dim 1 : vector<24x128xf32>, i32 -> vector<24x128xf32>
    %c126_i32 = arith.constant 126 : i32
    %30 = tpu.dynamic_rotate %22 by %c126_i32 dim 1 : vector<24x128xf32>, i32 -> vector<24x128xf32>
    %cst_10 = arith.constant -5.000000e+00 : f32
    %31 = vector.broadcast %cst_10 : f32 to vector<24x128xf32>
    %32 = arith.mulf %31, %22 : vector<24x128xf32>
    %33 = arith.addf %23, %24 : vector<24x128xf32>
    %34 = arith.addf %27, %28 : vector<24x128xf32>
    %35 = arith.addf %33, %34 : vector<24x128xf32>
    %cst_11 = arith.constant 1.33333337 : f32
    %36 = vector.broadcast %cst_11 : f32 to vector<24x128xf32>
    %37 = arith.mulf %36, %35 : vector<24x128xf32>
    %38 = arith.addf %32, %37 : vector<24x128xf32>
    %39 = arith.addf %25, %26 : vector<24x128xf32>
    %40 = arith.addf %29, %30 : vector<24x128xf32>
    %41 = arith.addf %39, %40 : vector<24x128xf32>
    %cst_12 = arith.constant -0.0833333358 : f32
    %42 = vector.broadcast %cst_12 : f32 to vector<24x128xf32>
    %43 = arith.mulf %42, %41 : vector<24x128xf32>
    %44 = arith.addf %38, %43 : vector<24x128xf32>
    %c0_13 = arith.constant 0 : index
    %c0_14 = arith.constant 0 : index
    %45 = vector.load %arg9[%c0_13, %c0_14] : memref<24x128xf32, #tpu.memory_space<vmem>>, vector<24x128xf32>
    %cst_15 = arith.constant 2.000000e+00 : f32
    %46 = vector.broadcast %cst_15 : f32 to vector<24x128xf32>
    %47 = arith.mulf %46, %22 : vector<24x128xf32>
    %48 = arith.subf %47, %45 : vector<24x128xf32>
    %c0_16 = arith.constant 0 : index
    %c0_17 = arith.constant 0 : index
    %49 = vector.load %arg5[%c0_16, %c0_17] : memref<24x128xf32, #tpu.memory_space<vmem>>, vector<24x128xf32>
    %50 = arith.mulf %49, %44 : vector<24x128xf32>
    %51 = arith.addf %48, %50 : vector<24x128xf32>
    %c0_18 = arith.constant 0 : index
    %c0_19 = arith.constant 0 : index
    %52 = vector.load %arg9[%c0_18, %c0_19] : memref<24x128xf32, #tpu.memory_space<vmem>>, vector<24x128xf32>
    tpu.vector_store %arg9[%c0_18, %c0_19], %51 {strides = array<i32>} : memref<24x128xf32, #tpu.memory_space<vmem>>, vector<24x128xf32>,
    %53 = arith.index_cast %3 : i32 to index
    %c0_20 = arith.constant 0 : index
    %54 = vector.load %arg9[%53, %c0_20] : memref<24x128xf32, #tpu.memory_space<vmem>>, vector<1x128xf32>
    %55 = arith.index_cast %21 : i32 to index
    %56 = memref.load %arg6[%55] : memref<8xf32, #tpu.memory_space<smem>>
    %57 = vector.broadcast %56 : f32 to vector<1x128xf32>
    %58 = arith.mulf %57, %16 : vector<1x128xf32>
    %59 = arith.addf %54, %58 : vector<1x128xf32>
    %60 = arith.index_cast %3 : i32 to index
    %c0_21 = arith.constant 0 : index
    %61 = vector.load %arg9[%60, %c0_21] : memref<24x128xf32, #tpu.memory_space<vmem>>, vector<1x128xf32>
    tpu.vector_store %arg9[%60, %c0_21], %59 {strides = array<i32>} : memref<24x128xf32, #tpu.memory_space<vmem>>, vector<1x128xf32>,
    %62 = arith.index_cast %4 : i32 to index
    %c0_22 = arith.constant 0 : index
    %63 = vector.load %arg9[%62, %c0_22] : memref<24x128xf32, #tpu.memory_space<vmem>>, vector<1x128xf32>
    %c1_i32_23 = arith.constant 1 : i32
    %64 = arith.addi %20, %c1_i32_23 : i32
    %c0_24 = arith.constant 0 : index
    %c0_25 = arith.constant 0 : index
    %65 = vector.load %arg9[%c0_24, %c0_25] : memref<24x128xf32, #tpu.memory_space<vmem>>, vector<24x128xf32>
    %c1_i32_26 = arith.constant 1 : i32
    %66 = tpu.dynamic_rotate %65 by %c1_i32_26 dim 0 : vector<24x128xf32>, i32 -> vector<24x128xf32>
    %c23_i32_27 = arith.constant 23 : i32
    %67 = tpu.dynamic_rotate %65 by %c23_i32_27 dim 0 : vector<24x128xf32>, i32 -> vector<24x128xf32>
    %c2_i32_28 = arith.constant 2 : i32
    %68 = tpu.dynamic_rotate %65 by %c2_i32_28 dim 0 : vector<24x128xf32>, i32 -> vector<24x128xf32>
    %c22_i32_29 = arith.constant 22 : i32
    %69 = tpu.dynamic_rotate %65 by %c22_i32_29 dim 0 : vector<24x128xf32>, i32 -> vector<24x128xf32>
    %c1_i32_30 = arith.constant 1 : i32
    %70 = tpu.dynamic_rotate %65 by %c1_i32_30 dim 1 : vector<24x128xf32>, i32 -> vector<24x128xf32>
    %c127_i32_31 = arith.constant 127 : i32
    %71 = tpu.dynamic_rotate %65 by %c127_i32_31 dim 1 : vector<24x128xf32>, i32 -> vector<24x128xf32>
    %c2_i32_32 = arith.constant 2 : i32
    %72 = tpu.dynamic_rotate %65 by %c2_i32_32 dim 1 : vector<24x128xf32>, i32 -> vector<24x128xf32>
    %c126_i32_33 = arith.constant 126 : i32
    %73 = tpu.dynamic_rotate %65 by %c126_i32_33 dim 1 : vector<24x128xf32>, i32 -> vector<24x128xf32>
    %cst_34 = arith.constant -5.000000e+00 : f32
    %74 = vector.broadcast %cst_34 : f32 to vector<24x128xf32>
    %75 = arith.mulf %74, %65 : vector<24x128xf32>
    %76 = arith.addf %66, %67 : vector<24x128xf32>
    %77 = arith.addf %70, %71 : vector<24x128xf32>
    %78 = arith.addf %76, %77 : vector<24x128xf32>
    %cst_35 = arith.constant 1.33333337 : f32
    %79 = vector.broadcast %cst_35 : f32 to vector<24x128xf32>
    %80 = arith.mulf %79, %78 : vector<24x128xf32>
    %81 = arith.addf %75, %80 : vector<24x128xf32>
    %82 = arith.addf %68, %69 : vector<24x128xf32>
    %83 = arith.addf %72, %73 : vector<24x128xf32>
    %84 = arith.addf %82, %83 : vector<24x128xf32>
    %cst_36 = arith.constant -0.0833333358 : f32
    %85 = vector.broadcast %cst_36 : f32 to vector<24x128xf32>
    %86 = arith.mulf %85, %84 : vector<24x128xf32>
    %87 = arith.addf %81, %86 : vector<24x128xf32>
    %c0_37 = arith.constant 0 : index
    %c0_38 = arith.constant 0 : index
    %88 = vector.load %arg8[%c0_37, %c0_38] : memref<24x128xf32, #tpu.memory_space<vmem>>, vector<24x128xf32>
    %cst_39 = arith.constant 2.000000e+00 : f32
    %89 = vector.broadcast %cst_39 : f32 to vector<24x128xf32>
    %90 = arith.mulf %89, %65 : vector<24x128xf32>
    %91 = arith.subf %90, %88 : vector<24x128xf32>
    %c0_40 = arith.constant 0 : index
    %c0_41 = arith.constant 0 : index
    %92 = vector.load %arg5[%c0_40, %c0_41] : memref<24x128xf32, #tpu.memory_space<vmem>>, vector<24x128xf32>
    %93 = arith.mulf %92, %87 : vector<24x128xf32>
    %94 = arith.addf %91, %93 : vector<24x128xf32>
    %c0_42 = arith.constant 0 : index
    %c0_43 = arith.constant 0 : index
    %95 = vector.load %arg8[%c0_42, %c0_43] : memref<24x128xf32, #tpu.memory_space<vmem>>, vector<24x128xf32>
    tpu.vector_store %arg8[%c0_42, %c0_43], %94 {strides = array<i32>} : memref<24x128xf32, #tpu.memory_space<vmem>>, vector<24x128xf32>,
    %96 = arith.index_cast %3 : i32 to index
    %c0_44 = arith.constant 0 : index
    %97 = vector.load %arg8[%96, %c0_44] : memref<24x128xf32, #tpu.memory_space<vmem>>, vector<1x128xf32>
    %98 = arith.index_cast %64 : i32 to index
    %99 = memref.load %arg6[%98] : memref<8xf32, #tpu.memory_space<smem>>
    %100 = vector.broadcast %99 : f32 to vector<1x128xf32>
    %101 = arith.mulf %100, %16 : vector<1x128xf32>
    %102 = arith.addf %97, %101 : vector<1x128xf32>
    %103 = arith.index_cast %3 : i32 to index
    %c0_45 = arith.constant 0 : index
    %104 = vector.load %arg8[%103, %c0_45] : memref<24x128xf32, #tpu.memory_space<vmem>>, vector<1x128xf32>
    tpu.vector_store %arg8[%103, %c0_45], %102 {strides = array<i32>} : memref<24x128xf32, #tpu.memory_space<vmem>>, vector<1x128xf32>,
    %105 = arith.index_cast %4 : i32 to index
    %c0_46 = arith.constant 0 : index
    %106 = vector.load %arg8[%105, %c0_46] : memref<24x128xf32, #tpu.memory_space<vmem>>, vector<1x128xf32>
    %c2_i32_47 = arith.constant 2 : i32
    %107 = arith.addi %20, %c2_i32_47 : i32
    %c0_48 = arith.constant 0 : index
    %c0_49 = arith.constant 0 : index
    %108 = vector.load %arg8[%c0_48, %c0_49] : memref<24x128xf32, #tpu.memory_space<vmem>>, vector<24x128xf32>
    %c1_i32_50 = arith.constant 1 : i32
    %109 = tpu.dynamic_rotate %108 by %c1_i32_50 dim 0 : vector<24x128xf32>, i32 -> vector<24x128xf32>
    %c23_i32_51 = arith.constant 23 : i32
    %110 = tpu.dynamic_rotate %108 by %c23_i32_51 dim 0 : vector<24x128xf32>, i32 -> vector<24x128xf32>
    %c2_i32_52 = arith.constant 2 : i32
    %111 = tpu.dynamic_rotate %108 by %c2_i32_52 dim 0 : vector<24x128xf32>, i32 -> vector<24x128xf32>
    %c22_i32_53 = arith.constant 22 : i32
    %112 = tpu.dynamic_rotate %108 by %c22_i32_53 dim 0 : vector<24x128xf32>, i32 -> vector<24x128xf32>
    %c1_i32_54 = arith.constant 1 : i32
    %113 = tpu.dynamic_rotate %108 by %c1_i32_54 dim 1 : vector<24x128xf32>, i32 -> vector<24x128xf32>
    %c127_i32_55 = arith.constant 127 : i32
    %114 = tpu.dynamic_rotate %108 by %c127_i32_55 dim 1 : vector<24x128xf32>, i32 -> vector<24x128xf32>
    %c2_i32_56 = arith.constant 2 : i32
    %115 = tpu.dynamic_rotate %108 by %c2_i32_56 dim 1 : vector<24x128xf32>, i32 -> vector<24x128xf32>
    %c126_i32_57 = arith.constant 126 : i32
    %116 = tpu.dynamic_rotate %108 by %c126_i32_57 dim 1 : vector<24x128xf32>, i32 -> vector<24x128xf32>
    %cst_58 = arith.constant -5.000000e+00 : f32
    %117 = vector.broadcast %cst_58 : f32 to vector<24x128xf32>
    %118 = arith.mulf %117, %108 : vector<24x128xf32>
    %119 = arith.addf %109, %110 : vector<24x128xf32>
    %120 = arith.addf %113, %114 : vector<24x128xf32>
    %121 = arith.addf %119, %120 : vector<24x128xf32>
    %cst_59 = arith.constant 1.33333337 : f32
    %122 = vector.broadcast %cst_59 : f32 to vector<24x128xf32>
    %123 = arith.mulf %122, %121 : vector<24x128xf32>
    %124 = arith.addf %118, %123 : vector<24x128xf32>
    %125 = arith.addf %111, %112 : vector<24x128xf32>
    %126 = arith.addf %115, %116 : vector<24x128xf32>
    %127 = arith.addf %125, %126 : vector<24x128xf32>
    %cst_60 = arith.constant -0.0833333358 : f32
    %128 = vector.broadcast %cst_60 : f32 to vector<24x128xf32>
    %129 = arith.mulf %128, %127 : vector<24x128xf32>
    %130 = arith.addf %124, %129 : vector<24x128xf32>
    %c0_61 = arith.constant 0 : index
    %c0_62 = arith.constant 0 : index
    %131 = vector.load %arg9[%c0_61, %c0_62] : memref<24x128xf32, #tpu.memory_space<vmem>>, vector<24x128xf32>
    %cst_63 = arith.constant 2.000000e+00 : f32
    %132 = vector.broadcast %cst_63 : f32 to vector<24x128xf32>
    %133 = arith.mulf %132, %108 : vector<24x128xf32>
    %134 = arith.subf %133, %131 : vector<24x128xf32>
    %c0_64 = arith.constant 0 : index
    %c0_65 = arith.constant 0 : index
    %135 = vector.load %arg5[%c0_64, %c0_65] : memref<24x128xf32, #tpu.memory_space<vmem>>, vector<24x128xf32>
    %136 = arith.mulf %135, %130 : vector<24x128xf32>
    %137 = arith.addf %134, %136 : vector<24x128xf32>
    %c0_66 = arith.constant 0 : index
    %c0_67 = arith.constant 0 : index
    %138 = vector.load %arg9[%c0_66, %c0_67] : memref<24x128xf32, #tpu.memory_space<vmem>>, vector<24x128xf32>
    tpu.vector_store %arg9[%c0_66, %c0_67], %137 {strides = array<i32>} : memref<24x128xf32, #tpu.memory_space<vmem>>, vector<24x128xf32>,
    %139 = arith.index_cast %3 : i32 to index
    %c0_68 = arith.constant 0 : index
    %140 = vector.load %arg9[%139, %c0_68] : memref<24x128xf32, #tpu.memory_space<vmem>>, vector<1x128xf32>
    %141 = arith.index_cast %107 : i32 to index
    %142 = memref.load %arg6[%141] : memref<8xf32, #tpu.memory_space<smem>>
    %143 = vector.broadcast %142 : f32 to vector<1x128xf32>
    %144 = arith.mulf %143, %16 : vector<1x128xf32>
    %145 = arith.addf %140, %144 : vector<1x128xf32>
    %146 = arith.index_cast %3 : i32 to index
    %c0_69 = arith.constant 0 : index
    %147 = vector.load %arg9[%146, %c0_69] : memref<24x128xf32, #tpu.memory_space<vmem>>, vector<1x128xf32>
    tpu.vector_store %arg9[%146, %c0_69], %145 {strides = array<i32>} : memref<24x128xf32, #tpu.memory_space<vmem>>, vector<1x128xf32>,
    %148 = arith.index_cast %4 : i32 to index
    %c0_70 = arith.constant 0 : index
    %149 = vector.load %arg9[%148, %c0_70] : memref<24x128xf32, #tpu.memory_space<vmem>>, vector<1x128xf32>
    %c3_i32 = arith.constant 3 : i32
    %150 = arith.addi %20, %c3_i32 : i32
    %c0_71 = arith.constant 0 : index
    %c0_72 = arith.constant 0 : index
    %151 = vector.load %arg9[%c0_71, %c0_72] : memref<24x128xf32, #tpu.memory_space<vmem>>, vector<24x128xf32>
    %c1_i32_73 = arith.constant 1 : i32
    %152 = tpu.dynamic_rotate %151 by %c1_i32_73 dim 0 : vector<24x128xf32>, i32 -> vector<24x128xf32>
    %c23_i32_74 = arith.constant 23 : i32
    %153 = tpu.dynamic_rotate %151 by %c23_i32_74 dim 0 : vector<24x128xf32>, i32 -> vector<24x128xf32>
    %c2_i32_75 = arith.constant 2 : i32
    %154 = tpu.dynamic_rotate %151 by %c2_i32_75 dim 0 : vector<24x128xf32>, i32 -> vector<24x128xf32>
    %c22_i32_76 = arith.constant 22 : i32
    %155 = tpu.dynamic_rotate %151 by %c22_i32_76 dim 0 : vector<24x128xf32>, i32 -> vector<24x128xf32>
    %c1_i32_77 = arith.constant 1 : i32
    %156 = tpu.dynamic_rotate %151 by %c1_i32_77 dim 1 : vector<24x128xf32>, i32 -> vector<24x128xf32>
    %c127_i32_78 = arith.constant 127 : i32
    %157 = tpu.dynamic_rotate %151 by %c127_i32_78 dim 1 : vector<24x128xf32>, i32 -> vector<24x128xf32>
    %c2_i32_79 = arith.constant 2 : i32
    %158 = tpu.dynamic_rotate %151 by %c2_i32_79 dim 1 : vector<24x128xf32>, i32 -> vector<24x128xf32>
    %c126_i32_80 = arith.constant 126 : i32
    %159 = tpu.dynamic_rotate %151 by %c126_i32_80 dim 1 : vector<24x128xf32>, i32 -> vector<24x128xf32>
    %cst_81 = arith.constant -5.000000e+00 : f32
    %160 = vector.broadcast %cst_81 : f32 to vector<24x128xf32>
    %161 = arith.mulf %160, %151 : vector<24x128xf32>
    %162 = arith.addf %152, %153 : vector<24x128xf32>
    %163 = arith.addf %156, %157 : vector<24x128xf32>
    %164 = arith.addf %162, %163 : vector<24x128xf32>
    %cst_82 = arith.constant 1.33333337 : f32
    %165 = vector.broadcast %cst_82 : f32 to vector<24x128xf32>
    %166 = arith.mulf %165, %164 : vector<24x128xf32>
    %167 = arith.addf %161, %166 : vector<24x128xf32>
    %168 = arith.addf %154, %155 : vector<24x128xf32>
    %169 = arith.addf %158, %159 : vector<24x128xf32>
    %170 = arith.addf %168, %169 : vector<24x128xf32>
    %cst_83 = arith.constant -0.0833333358 : f32
    %171 = vector.broadcast %cst_83 : f32 to vector<24x128xf32>
    %172 = arith.mulf %171, %170 : vector<24x128xf32>
    %173 = arith.addf %167, %172 : vector<24x128xf32>
    %c0_84 = arith.constant 0 : index
    %c0_85 = arith.constant 0 : index
    %174 = vector.load %arg8[%c0_84, %c0_85] : memref<24x128xf32, #tpu.memory_space<vmem>>, vector<24x128xf32>
    %cst_86 = arith.constant 2.000000e+00 : f32
    %175 = vector.broadcast %cst_86 : f32 to vector<24x128xf32>
    %176 = arith.mulf %175, %151 : vector<24x128xf32>
    %177 = arith.subf %176, %174 : vector<24x128xf32>
    %c0_87 = arith.constant 0 : index
    %c0_88 = arith.constant 0 : index
    %178 = vector.load %arg5[%c0_87, %c0_88] : memref<24x128xf32, #tpu.memory_space<vmem>>, vector<24x128xf32>
    %179 = arith.mulf %178, %173 : vector<24x128xf32>
    %180 = arith.addf %177, %179 : vector<24x128xf32>
    %c0_89 = arith.constant 0 : index
    %c0_90 = arith.constant 0 : index
    %181 = vector.load %arg8[%c0_89, %c0_90] : memref<24x128xf32, #tpu.memory_space<vmem>>, vector<24x128xf32>
    tpu.vector_store %arg8[%c0_89, %c0_90], %180 {strides = array<i32>} : memref<24x128xf32, #tpu.memory_space<vmem>>, vector<24x128xf32>,
    %182 = arith.index_cast %3 : i32 to index
    %c0_91 = arith.constant 0 : index
    %183 = vector.load %arg8[%182, %c0_91] : memref<24x128xf32, #tpu.memory_space<vmem>>, vector<1x128xf32>
    %184 = arith.index_cast %150 : i32 to index
    %185 = memref.load %arg6[%184] : memref<8xf32, #tpu.memory_space<smem>>
    %186 = vector.broadcast %185 : f32 to vector<1x128xf32>
    %187 = arith.mulf %186, %16 : vector<1x128xf32>
    %188 = arith.addf %183, %187 : vector<1x128xf32>
    %189 = arith.index_cast %3 : i32 to index
    %c0_92 = arith.constant 0 : index
    %190 = vector.load %arg8[%189, %c0_92] : memref<24x128xf32, #tpu.memory_space<vmem>>, vector<1x128xf32>
    tpu.vector_store %arg8[%189, %c0_92], %188 {strides = array<i32>} : memref<24x128xf32, #tpu.memory_space<vmem>>, vector<1x128xf32>,
    %191 = arith.index_cast %4 : i32 to index
    %c0_93 = arith.constant 0 : index
    %192 = vector.load %arg8[%191, %c0_93] : memref<24x128xf32, #tpu.memory_space<vmem>>, vector<1x128xf32>
    %c4_i32 = arith.constant 4 : i32
    %193 = arith.addi %20, %c4_i32 : i32
    %c0_94 = arith.constant 0 : index
    %c0_95 = arith.constant 0 : index
    %194 = vector.load %arg8[%c0_94, %c0_95] : memref<24x128xf32, #tpu.memory_space<vmem>>, vector<24x128xf32>
    %c1_i32_96 = arith.constant 1 : i32
    %195 = tpu.dynamic_rotate %194 by %c1_i32_96 dim 0 : vector<24x128xf32>, i32 -> vector<24x128xf32>
    %c23_i32_97 = arith.constant 23 : i32
    %196 = tpu.dynamic_rotate %194 by %c23_i32_97 dim 0 : vector<24x128xf32>, i32 -> vector<24x128xf32>
    %c2_i32_98 = arith.constant 2 : i32
    %197 = tpu.dynamic_rotate %194 by %c2_i32_98 dim 0 : vector<24x128xf32>, i32 -> vector<24x128xf32>
    %c22_i32_99 = arith.constant 22 : i32
    %198 = tpu.dynamic_rotate %194 by %c22_i32_99 dim 0 : vector<24x128xf32>, i32 -> vector<24x128xf32>
    %c1_i32_100 = arith.constant 1 : i32
    %199 = tpu.dynamic_rotate %194 by %c1_i32_100 dim 1 : vector<24x128xf32>, i32 -> vector<24x128xf32>
    %c127_i32_101 = arith.constant 127 : i32
    %200 = tpu.dynamic_rotate %194 by %c127_i32_101 dim 1 : vector<24x128xf32>, i32 -> vector<24x128xf32>
    %c2_i32_102 = arith.constant 2 : i32
    %201 = tpu.dynamic_rotate %194 by %c2_i32_102 dim 1 : vector<24x128xf32>, i32 -> vector<24x128xf32>
    %c126_i32_103 = arith.constant 126 : i32
    %202 = tpu.dynamic_rotate %194 by %c126_i32_103 dim 1 : vector<24x128xf32>, i32 -> vector<24x128xf32>
    %cst_104 = arith.constant -5.000000e+00 : f32
    %203 = vector.broadcast %cst_104 : f32 to vector<24x128xf32>
    %204 = arith.mulf %203, %194 : vector<24x128xf32>
    %205 = arith.addf %195, %196 : vector<24x128xf32>
    %206 = arith.addf %199, %200 : vector<24x128xf32>
    %207 = arith.addf %205, %206 : vector<24x128xf32>
    %cst_105 = arith.constant 1.33333337 : f32
    %208 = vector.broadcast %cst_105 : f32 to vector<24x128xf32>
    %209 = arith.mulf %208, %207 : vector<24x128xf32>
    %210 = arith.addf %204, %209 : vector<24x128xf32>
    %211 = arith.addf %197, %198 : vector<24x128xf32>
    %212 = arith.addf %201, %202 : vector<24x128xf32>
    %213 = arith.addf %211, %212 : vector<24x128xf32>
    %cst_106 = arith.constant -0.0833333358 : f32
    %214 = vector.broadcast %cst_106 : f32 to vector<24x128xf32>
    %215 = arith.mulf %214, %213 : vector<24x128xf32>
    %216 = arith.addf %210, %215 : vector<24x128xf32>
    %c0_107 = arith.constant 0 : index
    %c0_108 = arith.constant 0 : index
    %217 = vector.load %arg9[%c0_107, %c0_108] : memref<24x128xf32, #tpu.memory_space<vmem>>, vector<24x128xf32>
    %cst_109 = arith.constant 2.000000e+00 : f32
    %218 = vector.broadcast %cst_109 : f32 to vector<24x128xf32>
    %219 = arith.mulf %218, %194 : vector<24x128xf32>
    %220 = arith.subf %219, %217 : vector<24x128xf32>
    %c0_110 = arith.constant 0 : index
    %c0_111 = arith.constant 0 : index
    %221 = vector.load %arg5[%c0_110, %c0_111] : memref<24x128xf32, #tpu.memory_space<vmem>>, vector<24x128xf32>
    %222 = arith.mulf %221, %216 : vector<24x128xf32>
    %223 = arith.addf %220, %222 : vector<24x128xf32>
    %c0_112 = arith.constant 0 : index
    %c0_113 = arith.constant 0 : index
    %224 = vector.load %arg9[%c0_112, %c0_113] : memref<24x128xf32, #tpu.memory_space<vmem>>, vector<24x128xf32>
    tpu.vector_store %arg9[%c0_112, %c0_113], %223 {strides = array<i32>} : memref<24x128xf32, #tpu.memory_space<vmem>>, vector<24x128xf32>,
    %225 = arith.index_cast %3 : i32 to index
    %c0_114 = arith.constant 0 : index
    %226 = vector.load %arg9[%225, %c0_114] : memref<24x128xf32, #tpu.memory_space<vmem>>, vector<1x128xf32>
    %227 = arith.index_cast %193 : i32 to index
    %228 = memref.load %arg6[%227] : memref<8xf32, #tpu.memory_space<smem>>
    %229 = vector.broadcast %228 : f32 to vector<1x128xf32>
    %230 = arith.mulf %229, %16 : vector<1x128xf32>
    %231 = arith.addf %226, %230 : vector<1x128xf32>
    %232 = arith.index_cast %3 : i32 to index
    %c0_115 = arith.constant 0 : index
    %233 = vector.load %arg9[%232, %c0_115] : memref<24x128xf32, #tpu.memory_space<vmem>>, vector<1x128xf32>
    tpu.vector_store %arg9[%232, %c0_115], %231 {strides = array<i32>} : memref<24x128xf32, #tpu.memory_space<vmem>>, vector<1x128xf32>,
    %234 = arith.index_cast %4 : i32 to index
    %c0_116 = arith.constant 0 : index
    %235 = vector.load %arg9[%234, %c0_116] : memref<24x128xf32, #tpu.memory_space<vmem>>, vector<1x128xf32>
    %c5_i32 = arith.constant 5 : i32
    %236 = arith.addi %20, %c5_i32 : i32
    %c0_117 = arith.constant 0 : index
    %c0_118 = arith.constant 0 : index
    %237 = vector.load %arg9[%c0_117, %c0_118] : memref<24x128xf32, #tpu.memory_space<vmem>>, vector<24x128xf32>
    %c1_i32_119 = arith.constant 1 : i32
    %238 = tpu.dynamic_rotate %237 by %c1_i32_119 dim 0 : vector<24x128xf32>, i32 -> vector<24x128xf32>
    %c23_i32_120 = arith.constant 23 : i32
    %239 = tpu.dynamic_rotate %237 by %c23_i32_120 dim 0 : vector<24x128xf32>, i32 -> vector<24x128xf32>
    %c2_i32_121 = arith.constant 2 : i32
    %240 = tpu.dynamic_rotate %237 by %c2_i32_121 dim 0 : vector<24x128xf32>, i32 -> vector<24x128xf32>
    %c22_i32_122 = arith.constant 22 : i32
    %241 = tpu.dynamic_rotate %237 by %c22_i32_122 dim 0 : vector<24x128xf32>, i32 -> vector<24x128xf32>
    %c1_i32_123 = arith.constant 1 : i32
    %242 = tpu.dynamic_rotate %237 by %c1_i32_123 dim 1 : vector<24x128xf32>, i32 -> vector<24x128xf32>
    %c127_i32_124 = arith.constant 127 : i32
    %243 = tpu.dynamic_rotate %237 by %c127_i32_124 dim 1 : vector<24x128xf32>, i32 -> vector<24x128xf32>
    %c2_i32_125 = arith.constant 2 : i32
    %244 = tpu.dynamic_rotate %237 by %c2_i32_125 dim 1 : vector<24x128xf32>, i32 -> vector<24x128xf32>
    %c126_i32_126 = arith.constant 126 : i32
    %245 = tpu.dynamic_rotate %237 by %c126_i32_126 dim 1 : vector<24x128xf32>, i32 -> vector<24x128xf32>
    %cst_127 = arith.constant -5.000000e+00 : f32
    %246 = vector.broadcast %cst_127 : f32 to vector<24x128xf32>
    %247 = arith.mulf %246, %237 : vector<24x128xf32>
    %248 = arith.addf %238, %239 : vector<24x128xf32>
    %249 = arith.addf %242, %243 : vector<24x128xf32>
    %250 = arith.addf %248, %249 : vector<24x128xf32>
    %cst_128 = arith.constant 1.33333337 : f32
    %251 = vector.broadcast %cst_128 : f32 to vector<24x128xf32>
    %252 = arith.mulf %251, %250 : vector<24x128xf32>
    %253 = arith.addf %247, %252 : vector<24x128xf32>
    %254 = arith.addf %240, %241 : vector<24x128xf32>
    %255 = arith.addf %244, %245 : vector<24x128xf32>
    %256 = arith.addf %254, %255 : vector<24x128xf32>
    %cst_129 = arith.constant -0.0833333358 : f32
    %257 = vector.broadcast %cst_129 : f32 to vector<24x128xf32>
    %258 = arith.mulf %257, %256 : vector<24x128xf32>
    %259 = arith.addf %253, %258 : vector<24x128xf32>
    %c0_130 = arith.constant 0 : index
    %c0_131 = arith.constant 0 : index
    %260 = vector.load %arg8[%c0_130, %c0_131] : memref<24x128xf32, #tpu.memory_space<vmem>>, vector<24x128xf32>
    %cst_132 = arith.constant 2.000000e+00 : f32
    %261 = vector.broadcast %cst_132 : f32 to vector<24x128xf32>
    %262 = arith.mulf %261, %237 : vector<24x128xf32>
    %263 = arith.subf %262, %260 : vector<24x128xf32>
    %c0_133 = arith.constant 0 : index
    %c0_134 = arith.constant 0 : index
    %264 = vector.load %arg5[%c0_133, %c0_134] : memref<24x128xf32, #tpu.memory_space<vmem>>, vector<24x128xf32>
    %265 = arith.mulf %264, %259 : vector<24x128xf32>
    %266 = arith.addf %263, %265 : vector<24x128xf32>
    %c0_135 = arith.constant 0 : index
    %c0_136 = arith.constant 0 : index
    %267 = vector.load %arg8[%c0_135, %c0_136] : memref<24x128xf32, #tpu.memory_space<vmem>>, vector<24x128xf32>
    tpu.vector_store %arg8[%c0_135, %c0_136], %266 {strides = array<i32>} : memref<24x128xf32, #tpu.memory_space<vmem>>, vector<24x128xf32>,
    %268 = arith.index_cast %3 : i32 to index
    %c0_137 = arith.constant 0 : index
    %269 = vector.load %arg8[%268, %c0_137] : memref<24x128xf32, #tpu.memory_space<vmem>>, vector<1x128xf32>
    %270 = arith.index_cast %236 : i32 to index
    %271 = memref.load %arg6[%270] : memref<8xf32, #tpu.memory_space<smem>>
    %272 = vector.broadcast %271 : f32 to vector<1x128xf32>
    %273 = arith.mulf %272, %16 : vector<1x128xf32>
    %274 = arith.addf %269, %273 : vector<1x128xf32>
    %275 = arith.index_cast %3 : i32 to index
    %c0_138 = arith.constant 0 : index
    %276 = vector.load %arg8[%275, %c0_138] : memref<24x128xf32, #tpu.memory_space<vmem>>, vector<1x128xf32>
    tpu.vector_store %arg8[%275, %c0_138], %274 {strides = array<i32>} : memref<24x128xf32, #tpu.memory_space<vmem>>, vector<1x128xf32>,
    %277 = arith.index_cast %4 : i32 to index
    %c0_139 = arith.constant 0 : index
    %278 = vector.load %arg8[%277, %c0_139] : memref<24x128xf32, #tpu.memory_space<vmem>>, vector<1x128xf32>
    %c6_i32 = arith.constant 6 : i32
    %279 = arith.addi %20, %c6_i32 : i32
    %c0_140 = arith.constant 0 : index
    %c0_141 = arith.constant 0 : index
    %280 = vector.load %arg8[%c0_140, %c0_141] : memref<24x128xf32, #tpu.memory_space<vmem>>, vector<24x128xf32>
    %c1_i32_142 = arith.constant 1 : i32
    %281 = tpu.dynamic_rotate %280 by %c1_i32_142 dim 0 : vector<24x128xf32>, i32 -> vector<24x128xf32>
    %c23_i32_143 = arith.constant 23 : i32
    %282 = tpu.dynamic_rotate %280 by %c23_i32_143 dim 0 : vector<24x128xf32>, i32 -> vector<24x128xf32>
    %c2_i32_144 = arith.constant 2 : i32
    %283 = tpu.dynamic_rotate %280 by %c2_i32_144 dim 0 : vector<24x128xf32>, i32 -> vector<24x128xf32>
    %c22_i32_145 = arith.constant 22 : i32
    %284 = tpu.dynamic_rotate %280 by %c22_i32_145 dim 0 : vector<24x128xf32>, i32 -> vector<24x128xf32>
    %c1_i32_146 = arith.constant 1 : i32
    %285 = tpu.dynamic_rotate %280 by %c1_i32_146 dim 1 : vector<24x128xf32>, i32 -> vector<24x128xf32>
    %c127_i32_147 = arith.constant 127 : i32
    %286 = tpu.dynamic_rotate %280 by %c127_i32_147 dim 1 : vector<24x128xf32>, i32 -> vector<24x128xf32>
    %c2_i32_148 = arith.constant 2 : i32
    %287 = tpu.dynamic_rotate %280 by %c2_i32_148 dim 1 : vector<24x128xf32>, i32 -> vector<24x128xf32>
    %c126_i32_149 = arith.constant 126 : i32
    %288 = tpu.dynamic_rotate %280 by %c126_i32_149 dim 1 : vector<24x128xf32>, i32 -> vector<24x128xf32>
    %cst_150 = arith.constant -5.000000e+00 : f32
    %289 = vector.broadcast %cst_150 : f32 to vector<24x128xf32>
    %290 = arith.mulf %289, %280 : vector<24x128xf32>
    %291 = arith.addf %281, %282 : vector<24x128xf32>
    %292 = arith.addf %285, %286 : vector<24x128xf32>
    %293 = arith.addf %291, %292 : vector<24x128xf32>
    %cst_151 = arith.constant 1.33333337 : f32
    %294 = vector.broadcast %cst_151 : f32 to vector<24x128xf32>
    %295 = arith.mulf %294, %293 : vector<24x128xf32>
    %296 = arith.addf %290, %295 : vector<24x128xf32>
    %297 = arith.addf %283, %284 : vector<24x128xf32>
    %298 = arith.addf %287, %288 : vector<24x128xf32>
    %299 = arith.addf %297, %298 : vector<24x128xf32>
    %cst_152 = arith.constant -0.0833333358 : f32
    %300 = vector.broadcast %cst_152 : f32 to vector<24x128xf32>
    %301 = arith.mulf %300, %299 : vector<24x128xf32>
    %302 = arith.addf %296, %301 : vector<24x128xf32>
    %c0_153 = arith.constant 0 : index
    %c0_154 = arith.constant 0 : index
    %303 = vector.load %arg9[%c0_153, %c0_154] : memref<24x128xf32, #tpu.memory_space<vmem>>, vector<24x128xf32>
    %cst_155 = arith.constant 2.000000e+00 : f32
    %304 = vector.broadcast %cst_155 : f32 to vector<24x128xf32>
    %305 = arith.mulf %304, %280 : vector<24x128xf32>
    %306 = arith.subf %305, %303 : vector<24x128xf32>
    %c0_156 = arith.constant 0 : index
    %c0_157 = arith.constant 0 : index
    %307 = vector.load %arg5[%c0_156, %c0_157] : memref<24x128xf32, #tpu.memory_space<vmem>>, vector<24x128xf32>
    %308 = arith.mulf %307, %302 : vector<24x128xf32>
    %309 = arith.addf %306, %308 : vector<24x128xf32>
    %c0_158 = arith.constant 0 : index
    %c0_159 = arith.constant 0 : index
    %310 = vector.load %arg9[%c0_158, %c0_159] : memref<24x128xf32, #tpu.memory_space<vmem>>, vector<24x128xf32>
    tpu.vector_store %arg9[%c0_158, %c0_159], %309 {strides = array<i32>} : memref<24x128xf32, #tpu.memory_space<vmem>>, vector<24x128xf32>,
    %311 = arith.index_cast %3 : i32 to index
    %c0_160 = arith.constant 0 : index
    %312 = vector.load %arg9[%311, %c0_160] : memref<24x128xf32, #tpu.memory_space<vmem>>, vector<1x128xf32>
    %313 = arith.index_cast %279 : i32 to index
    %314 = memref.load %arg6[%313] : memref<8xf32, #tpu.memory_space<smem>>
    %315 = vector.broadcast %314 : f32 to vector<1x128xf32>
    %316 = arith.mulf %315, %16 : vector<1x128xf32>
    %317 = arith.addf %312, %316 : vector<1x128xf32>
    %318 = arith.index_cast %3 : i32 to index
    %c0_161 = arith.constant 0 : index
    %319 = vector.load %arg9[%318, %c0_161] : memref<24x128xf32, #tpu.memory_space<vmem>>, vector<1x128xf32>
    tpu.vector_store %arg9[%318, %c0_161], %317 {strides = array<i32>} : memref<24x128xf32, #tpu.memory_space<vmem>>, vector<1x128xf32>,
    %320 = arith.index_cast %4 : i32 to index
    %c0_162 = arith.constant 0 : index
    %321 = vector.load %arg9[%320, %c0_162] : memref<24x128xf32, #tpu.memory_space<vmem>>, vector<1x128xf32>
    %c7_i32 = arith.constant 7 : i32
    %322 = arith.addi %20, %c7_i32 : i32
    %c0_163 = arith.constant 0 : index
    %c0_164 = arith.constant 0 : index
    %323 = vector.load %arg9[%c0_163, %c0_164] : memref<24x128xf32, #tpu.memory_space<vmem>>, vector<24x128xf32>
    %c1_i32_165 = arith.constant 1 : i32
    %324 = tpu.dynamic_rotate %323 by %c1_i32_165 dim 0 : vector<24x128xf32>, i32 -> vector<24x128xf32>
    %c23_i32_166 = arith.constant 23 : i32
    %325 = tpu.dynamic_rotate %323 by %c23_i32_166 dim 0 : vector<24x128xf32>, i32 -> vector<24x128xf32>
    %c2_i32_167 = arith.constant 2 : i32
    %326 = tpu.dynamic_rotate %323 by %c2_i32_167 dim 0 : vector<24x128xf32>, i32 -> vector<24x128xf32>
    %c22_i32_168 = arith.constant 22 : i32
    %327 = tpu.dynamic_rotate %323 by %c22_i32_168 dim 0 : vector<24x128xf32>, i32 -> vector<24x128xf32>
    %c1_i32_169 = arith.constant 1 : i32
    %328 = tpu.dynamic_rotate %323 by %c1_i32_169 dim 1 : vector<24x128xf32>, i32 -> vector<24x128xf32>
    %c127_i32_170 = arith.constant 127 : i32
    %329 = tpu.dynamic_rotate %323 by %c127_i32_170 dim 1 : vector<24x128xf32>, i32 -> vector<24x128xf32>
    %c2_i32_171 = arith.constant 2 : i32
    %330 = tpu.dynamic_rotate %323 by %c2_i32_171 dim 1 : vector<24x128xf32>, i32 -> vector<24x128xf32>
    %c126_i32_172 = arith.constant 126 : i32
    %331 = tpu.dynamic_rotate %323 by %c126_i32_172 dim 1 : vector<24x128xf32>, i32 -> vector<24x128xf32>
    %cst_173 = arith.constant -5.000000e+00 : f32
    %332 = vector.broadcast %cst_173 : f32 to vector<24x128xf32>
    %333 = arith.mulf %332, %323 : vector<24x128xf32>
    %334 = arith.addf %324, %325 : vector<24x128xf32>
    %335 = arith.addf %328, %329 : vector<24x128xf32>
    %336 = arith.addf %334, %335 : vector<24x128xf32>
    %cst_174 = arith.constant 1.33333337 : f32
    %337 = vector.broadcast %cst_174 : f32 to vector<24x128xf32>
    %338 = arith.mulf %337, %336 : vector<24x128xf32>
    %339 = arith.addf %333, %338 : vector<24x128xf32>
    %340 = arith.addf %326, %327 : vector<24x128xf32>
    %341 = arith.addf %330, %331 : vector<24x128xf32>
    %342 = arith.addf %340, %341 : vector<24x128xf32>
    %cst_175 = arith.constant -0.0833333358 : f32
    %343 = vector.broadcast %cst_175 : f32 to vector<24x128xf32>
    %344 = arith.mulf %343, %342 : vector<24x128xf32>
    %345 = arith.addf %339, %344 : vector<24x128xf32>
    %c0_176 = arith.constant 0 : index
    %c0_177 = arith.constant 0 : index
    %346 = vector.load %arg8[%c0_176, %c0_177] : memref<24x128xf32, #tpu.memory_space<vmem>>, vector<24x128xf32>
    %cst_178 = arith.constant 2.000000e+00 : f32
    %347 = vector.broadcast %cst_178 : f32 to vector<24x128xf32>
    %348 = arith.mulf %347, %323 : vector<24x128xf32>
    %349 = arith.subf %348, %346 : vector<24x128xf32>
    %c0_179 = arith.constant 0 : index
    %c0_180 = arith.constant 0 : index
    %350 = vector.load %arg5[%c0_179, %c0_180] : memref<24x128xf32, #tpu.memory_space<vmem>>, vector<24x128xf32>
    %351 = arith.mulf %350, %345 : vector<24x128xf32>
    %352 = arith.addf %349, %351 : vector<24x128xf32>
    %c0_181 = arith.constant 0 : index
    %c0_182 = arith.constant 0 : index
    %353 = vector.load %arg8[%c0_181, %c0_182] : memref<24x128xf32, #tpu.memory_space<vmem>>, vector<24x128xf32>
    tpu.vector_store %arg8[%c0_181, %c0_182], %352 {strides = array<i32>} : memref<24x128xf32, #tpu.memory_space<vmem>>, vector<24x128xf32>,
    %354 = arith.index_cast %3 : i32 to index
    %c0_183 = arith.constant 0 : index
    %355 = vector.load %arg8[%354, %c0_183] : memref<24x128xf32, #tpu.memory_space<vmem>>, vector<1x128xf32>
    %356 = arith.index_cast %322 : i32 to index
    %357 = memref.load %arg6[%356] : memref<8xf32, #tpu.memory_space<smem>>
    %358 = vector.broadcast %357 : f32 to vector<1x128xf32>
    %359 = arith.mulf %358, %16 : vector<1x128xf32>
    %360 = arith.addf %355, %359 : vector<1x128xf32>
    %361 = arith.index_cast %3 : i32 to index
    %c0_184 = arith.constant 0 : index
    %362 = vector.load %arg8[%361, %c0_184] : memref<24x128xf32, #tpu.memory_space<vmem>>, vector<1x128xf32>
    tpu.vector_store %arg8[%361, %c0_184], %360 {strides = array<i32>} : memref<24x128xf32, #tpu.memory_space<vmem>>, vector<1x128xf32>,
    %363 = arith.index_cast %4 : i32 to index
    %c0_185 = arith.constant 0 : index
    %364 = vector.load %arg8[%363, %c0_185] : memref<24x128xf32, #tpu.memory_space<vmem>>, vector<1x128xf32>
    %365 = tpu.concatenate %63, %106, %149, %192, %235, %278, %321, %364 in 0 : vector<1x128xf32>, vector<1x128xf32>, vector<1x128xf32>, vector<1x128xf32>, vector<1x128xf32>, vector<1x128xf32>, vector<1x128xf32>, vector<1x128xf32> -> vector<8x128xf32>
    %c0_186 = arith.constant 0 : index
    %366 = arith.index_cast %19 : i32 to index
    %c0_187 = arith.constant 0 : index
    %367 = vector.load %arg7[%c0_186, %366, %c0_187] : memref<1x8x128xf32, #tpu.memory_space<vmem>>, vector<1x8x128xf32>
    %368 = vector.shape_cast %367 : vector<1x8x128xf32> to vector<8x128xf32>
    %369 = vector.shape_cast %365 : vector<8x128xf32> to vector<1x8x128xf32>
    tpu.vector_store %arg7[%c0_186, %366, %c0_187], %369 {strides = array<i32>} : memref<1x8x128xf32, #tpu.memory_space<vmem>>, vector<1x8x128xf32>,
    %c1_i32_188 = arith.constant 1 : i32
    return
  }
  func.func @transform_0(%arg0: i32, %arg1: i32, %arg2: memref<2xi32, #tpu.memory_space<smem>>, %arg3: memref<2xi32, #tpu.memory_space<smem>>, %arg4: memref<1xi32, #tpu.memory_space<smem>>) -> (i32, i32) {
    %c0_i32 = arith.constant 0 : i32
    %c0_i32_0 = arith.constant 0 : i32
    %c0_i32_1 = arith.constant 0 : i32
    return %c0_i32, %c0_i32_0 : i32, i32
  }
  func.func @transform_1(%arg0: i32, %arg1: i32, %arg2: memref<2xi32, #tpu.memory_space<smem>>, %arg3: memref<2xi32, #tpu.memory_space<smem>>, %arg4: memref<1xi32, #tpu.memory_space<smem>>) -> i32 {
    %c0_i32 = arith.constant 0 : i32
    %c0_i32_0 = arith.constant 0 : i32
    return %c0_i32 : i32
  }
  func.func @transform_2(%arg0: i32, %arg1: i32, %arg2: memref<2xi32, #tpu.memory_space<smem>>, %arg3: memref<2xi32, #tpu.memory_space<smem>>, %arg4: memref<1xi32, #tpu.memory_space<smem>>) -> (i32, i32, i32) {
    %c0_i32 = arith.constant 0 : i32
    %c0_i32_0 = arith.constant 0 : i32
    return %arg0, %arg1, %c0_i32 : i32, i32, i32
  }
}

</mosaic_0001>

<bundles_post_ra>
// kernel: tpu_custom_call.1
= control target key start
LH: loop header
LB: loop body
LE: loop exit
PB: predicated region body
PF: predicated region fallthrough
CT: control target
= control target key end

     0   :  { %s2405_s0 = inlined_call_operand.vmem [shape: s32[2], index: 0, kind: input, shape index: {}]   ;;  %s2406_s3 = inlined_call_operand.hbm [shape: f32[24,128], index: 3, kind: input, shape index: {}]   ;;  %s2407_s4 = inlined_call_operand.vmem [shape: f32[8], index: 4, kind: input, shape index: {}]   ;;  %s2408_s5 = inlined_call_operand.hbm [shape: f32[2,8,128], index: 5, kind: output, shape index: {}]   ;;  %s2409_s1 = inlined_call_operand.vmem [shape: s32[2], index: 1, kind: input, shape index: {}]   ;;  %s2410_s2 = inlined_call_operand.<no memory space> [shape: s32[1], index: 2, kind: input, shape index: {}]  }
   0x1   :  { %s10_s20 = sshll.u32 %s2405_s0, 4  ;;  %s14_s23 = sshll.u32 %s2409_s1, 4  ;;  %s11_s20 = int_to_ptr.vmem [resolvable:$true] %s10_s20  ;;  %s15_s23 = int_to_ptr.vmem [resolvable:$true] %s14_s23 }
   0x2   :  { %s1380_s24 = scalar_lea.vmem %s11_s20, 16  ;;  %p1385_p1 = scmp.lt.s32.totalorder %s11_s20, %s11_s20 }
   0x3   :  { %p1381_p0 = scmp.ne.s32.totalorder %s11_s20, %s1380_s24  ;;  %p1386_p2 = scmp.lt.s32.totalorder %s1380_s24, %s1380_s24 }
   0x5   :  { %p1387_p3 = por %p1386_p2, %p1385_p1 }
   0x7   :  { %p1388_p4 = pnand %p1387_p3, %p1381_p0 }
   0x9   :  { %1391 = shalt.err (!%p1388_p4)  }
   0xa   :  { %s1537_s25 = smov [#allocation5]   ;;  %s1392_s26 = scalar_lea.vmem %s15_s23, 16 }
   0xb   :  { %13 = dma.vmem_to_smem %s11_s20, 16, %s1537_s25, [#allocation4] }
   0xc   :  { %p1393_p5 = scmp.ne.s32.totalorder %s15_s23, %s1392_s26  ;;  %p1397_p6 = scmp.lt.s32.totalorder %s15_s23, %s15_s23 }
   0xd   :  { %p1398_p7 = scmp.lt.s32.totalorder %s1392_s26, %s1392_s26 }
   0xf   :  { %p1399_p8 = por %p1398_p7, %p1397_p6 }
  0x11   :  { %p1400_p9 = pnand %p1399_p8, %p1393_p5 }
  0x13   :  { %1403 = shalt.err (!%p1400_p9)  }
  0x14   :  { %s1538_s0 = smov [#allocation6]   ;;  %18 = sst [smem:[#allocation7]] %s2410_s2 }
  0x15   :  { %17 = dma.vmem_to_smem %s15_s23, 16, %s1538_s0, [#allocation4] }
  0x16   :  { %1499 = dma.done.wait [#allocation4], 32 }
  0x17   :  { %1500 = vsyncadd [#allocation4], 4294967264 }
  0x18   :  { %20 = sfence }
  0x19   :  { %21 = vsyncpa [#allocation9], 0 }
  0x1a   :  { %22 = vsyncpa [#allocation11], 0 }
  0x1b   :  { %23 = vsyncpa [#allocation10], 0 }
  0x1c   :  { %25 = vsyncpa [#allocation10 + $0x1], 0  ;;  %s1588_s28 = smov 0   ;;  %s1590_s29 = smov 0  }
  0x1d   :  { %s1592_s30 = smov 0   ;;  %s1594_s6 = smov 0  }
  0x1e   :  { %s1596_s7 = smov 0   ;;  %s1598_s8 = smov 0  }
  0x1f LB: > { %s1251_s2 = sadd.s32 4294967295, %s1535_s8   ;;  %s1252_s9 = sadd.s32 4294967294, %s1535_s8   ;;  %s1535_s8 = sphi %s1598_s8, %s31_s8   ;;  %s1531_s7 = sphi %s1596_s7, %s2428_s7   ;;  %s1527_s6 = sphi %s1594_s6, %s2427_s6   ;;  %s1523_s30 = sphi %s1592_s30, %s2426_s30   ;;  %s1519_s29 = sphi %s1590_s29, %s2425_s29   ;;  %s1515_s28 = sphi %s1588_s28, %s2424_s28  }
  0x20   : > { %s43_s10 = sadd.s32 1, %s1531_s7  ;;  %s94_s11 = sadd.s32 1, %s1523_s30 }
  0x21   : > { %p45_p10 = scmp.ge.s32.totalorder %s43_s10, 2  ;;  %p104_p11 = scmp.ne.s32.totalorder %s1523_s30, %s1519_s29 }
  0x22   : > { %p105_p12 = scmp.eq.s32.totalorder %s1251_s2, 1  ;;  %p110_p13 = scmp.ne.s32.totalorder %s1519_s29, %s1515_s28 }
  0x23   : > { %s2430_s10 = smov (%p45_p10, %s43_s10), 0  ;;  %p111_p1 = scmp.eq.s32.totalorder %s1252_s9, 1 }
  0x24   : > { %p1628_p0 = por %p105_p12, %p104_p11  ;;  %s89_s13 = ssub.s32 %s1531_s7, %s2430_s10 }
  0x25   : > { %p1253_p2 = scmp.ge.s32.totalorder %s1535_s8, 1  ;;  %p92_p3 = scmp.eq.s32.totalorder %s89_s13, 0 }
  0x26   : > { %s2415_s12 = scalar_select %p1628_p0, 1, 0 }
  0x27   : > { %p1635_p4 = por %p111_p1, %p110_p13  ;;  %p118_p5 = scmp.lt.s32.totalorder %s1535_s8, 3 }
  0x28   : > { %s1641_s15 = scalar_select %p92_p3, %s1523_s30, %s94_s11  }
  0x29   : > { %s2416_s14 = scalar_select %p1635_p4, 1, 0 }
  0x2a   : > { %p1643_p6 = pnand %p1253_p2, %p118_p5  ;;  %p1647_p7 = scmp.eq.s32.totalorder %s1251_s2, 0 }
  0x2b   : > { %s1539_s18 = smov [#allocation8]   ;;  %s144_s23 = sshll.u32 %s2407_s4, 4  ;;  %s1662_s23 = int_to_ptr.vmem [resolvable:$true] %s144_s23 }
  0x2c   : > { %s2417_s16 = scalar_select %p1643_p6, 1, 0 }
  0x2d   : > { %s2418_s17 = scalar_select %p1647_p7, 1, 0 }
  0x2e   : > { %p1281_p8 = pneg %p1643_p6  ;;  %s130_s19 = sshll.u32 %s1539_s18, 4  ;;  %s131_s19 = int_to_ptr.vmem [resolvable:$true] %s130_s19 }
  0x2f   : > { %s1404_s26 = scalar_lea.hbm %s2406_s3, 384 }
  0x30   : > { %p1655_p9 = pnand %p1647_p7, %p1281_p8  ;;  %p1405_p10 = scmp.ne.s32.totalorder %s2406_s3, %s1404_s26 }
  0x31   : > { %p1411_p1 = scmp.lt.u32.totalorder %s1404_s26, %s2406_s3 }
  0x32   : > { %p1406_p11 = pneg %p1655_p9 }
  0x34   : > { %p1407_p12 = pnand %p1406_p11, %p1405_p10 }
  0x36   : > { %p1408_p13 = pneg %p1407_p12 }
  0x38   : > { %p1413_p2 = pnand %p1411_p1, %p1408_p13 }
  0x3a   : > { %1416 = shalt.err (!%p1413_p2)
}
  0x3b   : > { %s1417_s9 = scalar_lea.vmem %s131_s19, 384  ;;  %p1425_p4 = scmp.lt.s32.totalorder %s131_s19, %s131_s19 }
  0x3c   : > { %p1418_p3 = scmp.ne.s32.totalorder %s131_s19, %s1417_s9  ;;  %p1426_p0 = scmp.lt.s32.totalorder %s1417_s9, %s1417_s9 }
  0x3e   : > { %p1420_p5 = pnand %p1418_p3, %p1406_p11  ;;  %p1427_p7 = por %p1426_p0, %p1425_p4 }
  0x40   : > { %p1421_p8 = pneg %p1420_p5 }
  0x42   : > { %p1428_p6 = pnand %p1427_p7, %p1421_p8 }
  0x44   : > { %1431 = shalt.err (!%p1428_p6)
}
  0x45   : > { %s1540_s11 = smov 128   ;;  %s1541_s13 = smov 8  }
  0x46   : > { %1284 = dma.hbm_to_vmem [thread:$0]  (!%p1655_p9), %s2406_s3, 384, %s131_s19, [#allocation9], %s1540_s11, %s1540_s11, %s1541_s13  }
  0x47   : > { %s1432_s22 = scalar_lea.vmem %s1662_s23, 16  ;;  %p1440_p4 = scmp.lt.s32.totalorder %s1662_s23, %s1662_s23 }
  0x48   : > { %p1433_p10 = scmp.ne.s32.totalorder %s1662_s23, %s1432_s22  ;;  %p1441_p6 = scmp.lt.s32.totalorder %s1432_s22, %s1432_s22 }
  0x4a   : > { %p1435_p12 = pnand %p1433_p10, %p1406_p11  ;;  %p1442_p7 = por %p1441_p6, %p1440_p4 }
  0x4c   : > { %p1436_p0 = pneg %p1435_p12 }
  0x4e   : > { %p1443_p13 = pnand %p1442_p7, %p1436_p0 }
  0x50   : > { %1446 = shalt.err (!%p1443_p13)
}
  0x51   : > { %s1542_s24 = smov [#allocation12]   ;;  %p2420_p1 = scmp.ne.s32.totalorder %s2417_s16, 0 }
  0x52   : > { %1287 = dma.vmem_to_smem (!%p1655_p9), %s1662_s23, 16, %s1542_s24, [#allocation11]  }
  0x53   : > { %157 = sbr.rel (%p2420_p1) target bundleno = 1425 (0x591), region = 28  ;;  %p2421_p2 = scmp.ne.s32.totalorder (!%p2420_p1), %s2418_s17, 0 }
  0x5a   : > { %1502 = dma.done.wait (%p2421_p2), [#allocation9], 384  }
  0x5b   : > { %1504 = vsyncadd (%p2421_p2), [#allocation9], 4294966912 }
  0x5c   : > { %1506 = dma.done.wait (%p2421_p2), [#allocation11], 16  }
  0x5d   : > { %1508 = vsyncadd (%p2421_p2), [#allocation11], 4294967280 }
  0x5e   : > { %167 = sfence }
  0x5f   : > { %v1543_v0 = vmov 0.0   ;;  %s1544_s19 = smov 127   ;;  %s1545_s20 = smov 1   ;;  %v192_v1 = vlaneseq  ;;  %v1724_v37 = vld [vmem:[#allocation8 + $0x10] sm:$0xff]  ;;  %v1726_v41 = vld [vmem:[#allocation8] sm:$0xff]  ;;  %v1728_v42 = vld [vmem:[#allocation8 + $0x8] sm:$0xff] }
  0x60   : > { %1362 = vrot.lane.b32.xlu1 %v1543_v0, %s1544_s19  ;;  %1357 = vrot.lane.b32.xlu0 %v1543_v0, %s1545_s20  ;;  %s1546_s16 = smov 2   ;;  %s1547_s23 = smov 126   ;;  %v206_v3 = vrot.slane %v1543_v0, 7  ;;  %v215_v4 = vrot.slane %v1543_v0, 1  ;;  %v222_v11 = vrot.slane %v1543_v0, 6  ;;  %v230_v12 = vrot.slane %v1543_v0, 2 }
  0x61   : > { %v1714_v2 = vshrl.u32 %v192_v1, 7  ;;  %s1721_s17 = sld [smem:[#allocation6 + %s1527_s6]]  ;;  %v193_v44 = vand.u32 127, %v192_v1  ;;  %vm1136_vm5 = vcmask 1040384   ;;  %vm1138_vm6 = vcmask 1041408   ;;  %p2422_p11 = scmp.ne.s32.totalorder %s2415_s12, 0 }
  0x62   : > { %v262_v14 = vadd.f32 %v215_v4, %v206_v3  ;;  %v279_v22 = vadd.f32 %v230_v12, %v222_v11  ;;  %s179_s25 = sld [smem:[#allocation5 + %s1527_s6]]  ;;  %vm1140_vm7 = vcmask 1042432   ;;  %vm1142_vm8 = vcmask 1043456  }
  0x63   : > { %vm210_vm0 = vcmp.lt.s32.totalorder %v1714_v2, 1  ;;  %vm217_vm1 = vcmp.lt.s32.totalorder %v1714_v2, 7  ;;  %vm224_vm2 = vcmp.lt.s32.totalorder %v1714_v2, 2  ;;  %vm231_vm3 = vcmp.lt.s32.totalorder %v1714_v2, 6  ;;  %s315_s26 = sld [smem:[#allocation12]]  ;;  %s1260_s27 = sld [smem:[#allocation12 + $0x1]] }
  0x64   : > { %245 = vrot.lane.b32.xlu1 %v1543_v0, %s1544_s19  ;;  %239 = vrot.lane.b32.xlu0 %v1543_v0, %s1545_s20  ;;  %s1885_s9 = sld [smem:[#allocation7]]  ;;  %s1261_s11 = sld [smem:[#allocation12 + $0x2]]  ;;  %vm1144_vm9 = vcmask 1044480   ;;  %vm1146_vm10 = vcmask 1045504   ;;  %vm1148_vm11 = vcmask 1046528  }
  0x65   : > { %s1262_s18 = sld [smem:[#allocation12 + $0x3]]  ;;  %s1263_s22 = sld [smem:[#allocation12 + $0x4]] }
  0x66   : > { %s1264_s24 = sld [smem:[#allocation12 + $0x5]] }
  0x67   : > { %s196_s0 = scalar_lea.vmem [#allocation8], %s1721_s17  ;;  %s1738_s1 = scalar_lea.vmem [#allocation3], %s1721_s17 }
  0x68   : > { %251 = vrot.lane.b32.xlu1 %v1543_v0, %s1546_s16  ;;  %1367 = vrot.lane.b32.xlu0 %v1543_v0, %s1546_s16  ;;  %v197_v45 = vld [vmem:[%s196_s0] sm:$0x1]  ;;  %v194_v48 = vstv %s179_s25  ;;  %s1819_s2 = scalar_lea.vmem [#allocation2], %s1721_s17  ;;  %s1265_s17 = sld [smem:[#allocation12 + $0x6]] }
  0x69   : > { %v198_v51 = vmul.f32 0.0025, %v197_v45  ;;  %vm195_vm4 = vcmp.eq.s32.totalorder %v193_v44, %v194_v48  ;;  %v316_v52 = vstv %s315_s26 }
  0x6a   : > { %s1900_s13 = scalar_lea.vmem [#allocation3], %s1885_s9  ;;  %s1987_s21 = scalar_lea.vmem [#allocation2], %s1885_s9 }
  0x6b   : > { %v1734_v53 = vsel %vm195_vm4, %v198_v51, 0.0  ;;  %s1548_s9 = smov [#allocation13]  }
  0x6c   : > { %257 = vrot.lane.b32.xlu1 %v1543_v0, %s1547_s23  ;;  %1372 = vrot.lane.b32.xlu0 %v1543_v0, %s1547_s23  ;;  %v317_v54 = vmul.f32 %v316_v52, %v1734_v53 }
  0xd2   : > { %v1363_v5 = vpop.permute.xlu1 %1362  ;;  %v1358_v6 = vpop.permute.xlu0 %1357 }
  0xd3   : > { %v1364_v7 = vunpack.i.l.bf16 %v1363_v5  ;;  %v1365_v8 = vunpack.i.h.bf16 %v1363_v5 }
  0xd5   : > { %v1376_v15 = vadd.low.f32.bf16 %v1364_v7, %v1358_v6  ;;  %v1377_v16 = vadd.high.f32.bf16 %v1365_v8, %v1358_v6 }
  0xd6   : > { %v246_v9 = vpop.permute.xlu1 %245  ;;  %v240_v10 = vpop.permute.xlu0 %239 }
  0xd7   : > { %v267_v13 = vadd.f32 %v246_v9, %v240_v10  ;;  %v268_v20 = vadd.f32 %v1376_v15, %v262_v14  ;;  %v269_v21 = vadd.f32 %v1377_v16, %v262_v14 }
  0xd9   : > { %v270_v17 = vadd.f32 %v267_v13, %v262_v14  ;;  %v271_v29 = vmul.f32 1.3333334, %v268_v20  ;;  %v272_v30 = vmul.f32 1.3333334, %v269_v21 }
  0xda   : > { %v252_v18 = vpop.permute.xlu1 %251  ;;  %v1368_v19 = vpop.permute.xlu0 %1367 }
  0xdb   : > { %v273_v23 = vmul.f32 1.3333334, %v270_v17 }
  0xde   : > { %v258_v24 = vpop.permute.xlu1 %257  ;;  %v1373_v25 = vpop.permute.xlu0 %1372 }
  0xdf   : > { %v282_v26 = vadd.f32 %v258_v24, %v252_v18  ;;  %v1375_v27 = vunpack.i.h.bf16 %v1373_v25  ;;  %v1374_v28 = vunpack.i.l.bf16 %v1373_v25 }
  0xe1   : > { %v285_v31 = vadd.f32 %v282_v26, %v279_v22  ;;  %v1378_v32 = vadd.low.f32.bf16 %v1374_v28, %v1368_v19  ;;  %v1379_v33 = vadd.high.f32.bf16 %v1375_v27, %v1368_v19 }
  0xe3   : > { %v288_v34 = vmul.f32 -0.083333336, %v285_v31  ;;  %v283_v35 = vadd.f32 %v1378_v32, %v279_v22  ;;  %v284_v36 = vadd.f32 %v1379_v33, %v279_v22 }
  0xe5   : > { %v291_v38 = vadd.f32 %v288_v34, %v273_v23  ;;  %v286_v39 = vmul.f32 -0.083333336, %v283_v35  ;;  %v287_v40 = vmul.f32 -0.083333336, %v284_v36 }
  0xe7   : > { %v306_v43 = vmul.f32 %v1724_v37, %v291_v38  ;;  %v289_v46 = vadd.f32 %v286_v39, %v271_v29  ;;  %v290_v47 = vadd.f32 %v287_v40, %v272_v30 }
  0xe9   : > { %v304_v49 = vmul.f32 %v1726_v41, %v289_v46  ;;  %v305_v50 = vmul.f32 %v1728_v42, %v290_v47  ;;  %312 = vst [vmem:[#allocation3 + $0x10] sm:$0xff] %v306_v43 }
  0xeb   : > { %310 = vst [vmem:[#allocation3] sm:$0xff] %v304_v49  ;;  %311 = vst [vmem:[#allocation3 + $0x8] sm:$0xff] %v305_v50 }
  0xf2   : > { %v314_v55 = vld [vmem:[%s1738_s1] sm:$0x1] }
  0xf3   : > { %v318_v56 = vadd.f32 %v317_v54, %v314_v55 }
  0xf5   : > { %319 = vst [vmem:[%s1738_s1] sm:$0x1] %v318_v56 }
  0xfc   : > { %v1742_v57 = vld [vmem:[#allocation3 + $0x8] sm:$0xff]  ;;  %v1744_v58 = vld [vmem:[#allocation3] sm:$0xff]  ;;  %v1750_v59 = vld [vmem:[#allocation3 + $0x10] sm:$0xff] }
  0xfd   : > { %352 = vrot.lane.b32.xlu1 %v1742_v57, %s1545_s20  ;;  %350 = vrot.lane.b32.xlu0 %v1744_v58, %s1545_s20  ;;  %v328_v62 = vrot.slane %v1750_v59, 7  ;;  %v333_v63 = vrot.slane %v1742_v57, 1  ;;  %v326_v0 = vrot.slane %v1744_v58, 7  ;;  %v332_v1 = vrot.slane %v1744_v58, 1 }
  0xfe   : > { %v327_v7 = vrot.slane %v1742_v57, 7  ;;  %v334_v8 = vrot.slane %v1750_v59, 1  ;;  %v340_v12 = vrot.slane %v1750_v59, 6  ;;  %v345_v13 = vrot.slane %v1742_v57, 2 }
  0xff   : > { %v331_v5 = vsel %vm210_vm0, %v328_v62, %v326_v0  ;;  %v336_v6 = vsel %vm217_vm1, %v332_v1, %v333_v63  ;;  %v338_v14 = vrot.slane %v1744_v58, 6  ;;  %v344_v15 = vrot.slane %v1744_v58, 2 }
 0x100   : > { %v377_v16 = vadd.f32 %v336_v6, %v331_v5  ;;  %v329_v17 = vsel %vm210_vm0, %v327_v7, %v328_v62  ;;  %v337_v18 = vsel %vm217_vm1, %v334_v8, %v332_v1  ;;  %v339_v19 = vrot.slane %v1742_v57, 6 }
 0x101   : > { %356 = vrot.lane.b32.xlu1 %v1744_v58, %s1544_s19  ;;  %354 = vrot.lane.b32.xlu0 %v1750_v59, %s1545_s20  ;;  %v335_v22 = vsel %vm217_vm1, %v333_v63, %v334_v8  ;;  %v330_v23 = vsel %vm210_vm0, %v326_v0, %v327_v7  ;;  %v343_v27 = vsel %vm224_vm2, %v340_v12, %v338_v14  ;;  %v346_v29 = vrot.slane %v1750_v59, 2 }
 0x102   : > { %v348_v28 = vsel %vm231_vm3, %v344_v15, %v345_v13  ;;  %v379_v30 = vadd.f32 %v337_v18, %v329_v17  ;;  %v378_v31 = vadd.f32 %v335_v22, %v330_v23  ;;  %v341_v32 = vsel %vm224_vm2, %v339_v19, %v340_v12 }
 0x103   : > { %v392_v36 = vadd.f32 %v348_v28, %v343_v27  ;;  %v342_v39 = vsel %vm224_vm2, %v338_v14, %v339_v19  ;;  %v349_v44 = vsel %vm231_vm3, %v346_v29, %v344_v15  ;;  %v347_v45 = vsel %vm231_vm3, %v345_v13, %v346_v29 }
 0x104   : > { %v374_v46 = vmul.f32 -5.0, %v1744_v58  ;;  %v410_v48 = vmul.f32 2.0, %v1744_v58  ;;  %v394_v52 = vadd.f32 %v349_v44, %v341_v32  ;;  %v393_v55 = vadd.f32 %v347_v45, %v342_v39 }
 0x105   : > { %360 = vrot.lane.b32.xlu1 %v1750_v59, %s1544_s19  ;;  %358 = vrot.lane.b32.xlu0 %v1742_v57, %s1544_s19  ;;  %v376_v63 = vmul.f32 -5.0, %v1750_v59  ;;  %v375_v0 = vmul.f32 -5.0, %v1742_v57  ;;  %v412_v6 = vmul.f32 2.0, %v1750_v59  ;;  %v411_v7 = vmul.f32 2.0, %v1742_v57 }
 0x106   : > { %v431_v19 = vstv %s1260_s27 }
 0x109   : > { %364 = vrot.lane.b32.xlu1 %v1742_v57, %s1546_s16  ;;  %362 = vrot.lane.b32.xlu0 %v1744_v58, %s1546_s16 }
 0x10d   : > { %368 = vrot.lane.b32.xlu1 %v1744_v58, %s1547_s23  ;;  %366 = vrot.lane.b32.xlu0 %v1750_v59, %s1546_s16 }
 0x111   : > { %372 = vrot.lane.b32.xlu1 %v1750_v59, %s1547_s23  ;;  %370 = vrot.lane.b32.xlu0 %v1742_v57, %s1547_s23 }
 0x16f   : > { %v353_v60 = vpop.permute.xlu1 %352  ;;  %v351_v61 = vpop.permute.xlu0 %350 }
 0x173   : > { %v357_v3 = vpop.permute.xlu1 %356  ;;  %v355_v4 = vpop.permute.xlu0 %354 }
 0x174   : > { %v380_v9 = vadd.f32 %v357_v3, %v351_v61 }
 0x176   : > { %v383_v20 = vadd.f32 %v380_v9, %v377_v16 }
 0x177   : > { %v361_v10 = vpop.permute.xlu1 %360  ;;  %v359_v11 = vpop.permute.xlu0 %358 }
 0x178   : > { %v382_v21 = vadd.f32 %v361_v10, %v355_v4  ;;  %v381_v26 = vadd.f32 %v359_v11, %v353_v60  ;;  %v386_v33 = vmul.f32 1.3333334, %v383_v20  ;;  %v432_v20 = vmul.f32 %v431_v19, %v1734_v53 }
 0x17a   : > { %v385_v34 = vadd.f32 %v382_v21, %v379_v30  ;;  %v384_v40 = vadd.f32 %v381_v26, %v378_v31  ;;  %v389_v49 = vadd.f32 %v386_v33, %v374_v46 }
 0x17b   : > { %v365_v24 = vpop.permute.xlu1 %364  ;;  %v363_v25 = vpop.permute.xlu0 %362 }
 0x17c   : > { %v388_v50 = vmul.f32 1.3333334, %v385_v34  ;;  %v387_v56 = vmul.f32 1.3333334, %v384_v40 }
 0x17e   : > { %v391_v5 = vadd.f32 %v388_v50, %v376_v63  ;;  %v390_v8 = vadd.f32 %v387_v56, %v375_v0 }
 0x17f   : > { %v369_v35 = vpop.permute.xlu1 %368  ;;  %v367_v38 = vpop.permute.xlu0 %366 }
 0x180   : > { %v395_v43 = vadd.f32 %v369_v35, %v363_v25 }
 0x182   : > { %v398_v47 = vadd.f32 %v395_v43, %v392_v36 }
 0x183   : > { %v373_v51 = vpop.permute.xlu1 %372  ;;  %v371_v54 = vpop.permute.xlu0 %370 }
 0x184   : > { %v401_v60 = vmul.f32 -0.083333336, %v398_v47  ;;  %v397_v61 = vadd.f32 %v373_v51, %v367_v38  ;;  %v396_v62 = vadd.f32 %v371_v54, %v365_v24 }
 0x186   : > { %v404_v1 = vadd.f32 %v401_v60, %v389_v49  ;;  %v400_v3 = vadd.f32 %v397_v61, %v394_v52  ;;  %v399_v4 = vadd.f32 %v396_v62, %v393_v55 }
 0x188   : > { %v419_v9 = vmul.f32 %v404_v1, %v1726_v41  ;;  %v403_v10 = vmul.f32 -0.083333336, %v400_v3  ;;  %v402_v11 = vmul.f32 -0.083333336, %v399_v4 }
 0x18a   : > { %v422_v12 = vadd.f32 %v419_v9, %v410_v48  ;;  %v406_v13 = vadd.f32 %v403_v10, %v391_v5  ;;  %v405_v14 = vadd.f32 %v402_v11, %v390_v8 }
 0x18c   : > { %425 = vst [vmem:[#allocation2] sm:$0xff] %v422_v12  ;;  %v421_v15 = vmul.f32 %v406_v13, %v1724_v37  ;;  %v420_v16 = vmul.f32 %v405_v14, %v1728_v42 }
 0x18e   : > { %v424_v17 = vadd.f32 %v421_v15, %v412_v6  ;;  %v423_v18 = vadd.f32 %v420_v16, %v411_v7 }
 0x190   : > { %427 = vst [vmem:[#allocation2 + $0x10] sm:$0xff] %v424_v17  ;;  %426 = vst [vmem:[#allocation2 + $0x8] sm:$0xff] %v423_v18 }
 0x197   : > { %v429_v21 = vld [vmem:[%s1819_s2] sm:$0x1] }
 0x198   : > { %v433_v22 = vadd.f32 %v432_v20, %v429_v21 }
 0x19a   : > { %434 = vst [vmem:[%s1819_s2] sm:$0x1] %v433_v22 }
 0x1a1   : > { %v1823_v23 = vld [vmem:[#allocation2 + $0x8] sm:$0xff]  ;;  %v1825_v24 = vld [vmem:[#allocation2] sm:$0xff]  ;;  %v1831_v25 = vld [vmem:[#allocation2 + $0x10] sm:$0xff] }
 0x1a2   : > { %467 = vrot.lane.b32.xlu1 %v1823_v23, %s1545_s20  ;;  %465 = vrot.lane.b32.xlu0 %v1825_v24, %s1545_s20  ;;  %v443_v28 = vrot.slane %v1831_v25, 7  ;;  %v448_v29 = vrot.slane %v1823_v23, 1  ;;  %v441_v30 = vrot.slane %v1825_v24, 7  ;;  %v447_v31 = vrot.slane %v1825_v24, 1 }
 0x1a3   : > { %v442_v36 = vrot.slane %v1823_v23, 7  ;;  %v449_v38 = vrot.slane %v1831_v25, 1  ;;  %v455_v44 = vrot.slane %v1831_v25, 6  ;;  %v460_v45 = vrot.slane %v1823_v23, 2 }
 0x1a4   : > { %v446_v34 = vsel %vm210_vm0, %v443_v28, %v441_v30  ;;  %v451_v35 = vsel %vm217_vm1, %v447_v31, %v448_v29  ;;  %v453_v46 = vrot.slane %v1825_v24, 6  ;;  %v459_v47 = vrot.slane %v1825_v24, 2 }
 0x1a5   : > { %v492_v48 = vadd.f32 %v451_v35, %v446_v34  ;;  %v444_v49 = vsel %vm210_vm0, %v442_v36, %v443_v28  ;;  %v452_v50 = vsel %vm217_vm1, %v449_v38, %v447_v31  ;;  %v454_v51 = vrot.slane %v1823_v23, 6 }
 0x1a6   : > { %471 = vrot.lane.b32.xlu1 %v1825_v24, %s1544_s19  ;;  %469 = vrot.lane.b32.xlu0 %v1831_v25, %s1545_s20  ;;  %v450_v55 = vsel %vm217_vm1, %v448_v29, %v449_v38  ;;  %v445_v56 = vsel %vm210_vm0, %v441_v30, %v442_v36  ;;  %v458_v63 = vsel %vm224_vm2, %v455_v44, %v453_v46  ;;  %v461_v1 = vrot.slane %v1831_v25, 2 }
 0x1a7   : > { %v463_v0 = vsel %vm231_vm3, %v459_v47, %v460_v45  ;;  %v494_v3 = vadd.f32 %v452_v50, %v444_v49  ;;  %v493_v4 = vadd.f32 %v450_v55, %v445_v56  ;;  %v456_v5 = vsel %vm224_vm2, %v454_v51, %v455_v44 }
 0x1a8   : > { %v507_v9 = vadd.f32 %v463_v0, %v458_v63  ;;  %v457_v11 = vsel %vm224_vm2, %v453_v46, %v454_v51  ;;  %v464_v14 = vsel %vm231_vm3, %v461_v1, %v459_v47  ;;  %v462_v15 = vsel %vm231_vm3, %v460_v45, %v461_v1  ;;  %v1903_v51 = vld [vmem:[%s1900_s13] sm:$0x1] }
 0x1a9   : > { %v489_v16 = vmul.f32 -5.0, %v1825_v24  ;;  %v525_v18 = vmul.f32 2.0, %v1825_v24  ;;  %v509_v22 = vadd.f32 %v464_v14, %v456_v5 }
 0x1aa   : > { %475 = vrot.lane.b32.xlu1 %v1831_v25, %s1544_s19  ;;  %473 = vrot.lane.b32.xlu0 %v1823_v23, %s1544_s19 }
 0x1ae   : > { %479 = vrot.lane.b32.xlu1 %v1823_v23, %s1546_s16  ;;  %477 = vrot.lane.b32.xlu0 %v1825_v24, %s1546_s16 }
 0x1b2   : > { %483 = vrot.lane.b32.xlu1 %v1825_v24, %s1547_s23  ;;  %481 = vrot.lane.b32.xlu0 %v1831_v25, %s1546_s16 }
 0x1b6   : > { %487 = vrot.lane.b32.xlu1 %v1831_v25, %s1547_s23  ;;  %485 = vrot.lane.b32.xlu0 %v1823_v23, %s1547_s23 }
 0x214   : > { %v468_v26 = vpop.permute.xlu1 %467  ;;  %v466_v27 = vpop.permute.xlu0 %465 }
 0x218   : > { %v472_v32 = vpop.permute.xlu1 %471  ;;  %v470_v33 = vpop.permute.xlu0 %469 }
 0x219   : > { %v495_v39 = vadd.f32 %v472_v32, %v466_v27  ;;  %v508_v27 = vadd.f32 %v462_v15, %v457_v11  ;;  %v491_v32 = vmul.f32 -5.0, %v1831_v25 }
 0x21b   : > { %v498_v52 = vadd.f32 %v495_v39, %v492_v48  ;;  %v528_v39 = vsub.f32 %v525_v18, %v1744_v58 }
 0x21c   : > { %v476_v40 = vpop.permute.xlu1 %475  ;;  %v474_v43 = vpop.permute.xlu0 %473 }
 0x21d   : > { %v497_v54 = vadd.f32 %v476_v40, %v470_v33  ;;  %v496_v62 = vadd.f32 %v474_v43, %v468_v26  ;;  %v501_v6 = vmul.f32 1.3333334, %v498_v52  ;;  %v490_v33 = vmul.f32 -5.0, %v1823_v23 }
 0x21e   : > { %v527_v40 = vmul.f32 2.0, %v1831_v25  ;;  %v526_v43 = vmul.f32 2.0, %v1823_v23 }
 0x21f   : > { %v500_v7 = vadd.f32 %v497_v54, %v494_v3  ;;  %v499_v12 = vadd.f32 %v496_v62, %v493_v4  ;;  %v504_v19 = vadd.f32 %v501_v6, %v489_v16 }
 0x220   : > { %v480_v60 = vpop.permute.xlu1 %479  ;;  %v478_v61 = vpop.permute.xlu0 %477  ;;  %v530_v58 = vsub.f32 %v527_v40, %v1750_v59  ;;  %v529_v54 = vsub.f32 %v526_v43, %v1742_v57 }
 0x221   : > { %v503_v20 = vmul.f32 1.3333334, %v500_v7  ;;  %v502_v28 = vmul.f32 1.3333334, %v499_v12 }
 0x223   : > { %v506_v38 = vadd.f32 %v503_v20, %v491_v32  ;;  %v505_v44 = vadd.f32 %v502_v28, %v490_v33 }
 0x224   : > { %v484_v8 = vpop.permute.xlu1 %483  ;;  %v482_v10 = vpop.permute.xlu0 %481 }
 0x225   : > { %v510_v13 = vadd.f32 %v484_v8, %v478_v61  ;;  %v545_v61 = vstv %s1261_s11  ;;  %s1451_s11 = sshll.u32 %s1548_s9, 4  ;;  %s1452_s11 = int_to_ptr.vmem [resolvable:$false] %s1451_s11 }
 0x226   : > { %v546_v62 = vmul.f32 %v545_v61, %v1734_v53 }
 0x227   : > { %v513_v17 = vadd.f32 %v510_v13, %v507_v9 }
 0x228   : > { %v488_v21 = vpop.permute.xlu1 %487  ;;  %v486_v26 = vpop.permute.xlu0 %485 }
 0x229   : > { %v516_v29 = vmul.f32 -0.083333336, %v513_v17  ;;  %v512_v30 = vadd.f32 %v488_v21, %v482_v10  ;;  %v511_v31 = vadd.f32 %v486_v26, %v480_v60 }
 0x22b   : > { %v519_v34 = vadd.f32 %v516_v29, %v504_v19  ;;  %v515_v35 = vadd.f32 %v512_v30, %v509_v22  ;;  %v514_v36 = vadd.f32 %v511_v31, %v508_v27 }
 0x22d   : > { %v534_v45 = vmul.f32 %v519_v34, %v1726_v41  ;;  %v518_v46 = vmul.f32 -0.083333336, %v515_v35  ;;  %v517_v47 = vmul.f32 -0.083333336, %v514_v36 }
 0x22f   : > { %v537_v48 = vadd.f32 %v534_v45, %v528_v39  ;;  %v521_v49 = vadd.f32 %v518_v46, %v506_v38  ;;  %v520_v50 = vadd.f32 %v517_v47, %v505_v44 }
 0x231   : > { %540 = vst [vmem:[#allocation3] sm:$0xff] %v537_v48  ;;  %v536_v52 = vmul.f32 %v521_v49, %v1724_v37  ;;  %v535_v55 = vmul.f32 %v520_v50, %v1728_v42 }
 0x233   : > { %v539_v56 = vadd.f32 %v536_v52, %v530_v58  ;;  %v538_v60 = vadd.f32 %v535_v55, %v529_v54 }
 0x235   : > { %542 = vst [vmem:[#allocation3 + $0x10] sm:$0xff] %v539_v56  ;;  %541 = vst [vmem:[#allocation3 + $0x8] sm:$0xff] %v538_v60 }
 0x23c   : > { %v543_v63 = vld [vmem:[%s1738_s1] sm:$0x1] }
 0x23d   : > { %v547_v0 = vadd.f32 %v546_v62, %v543_v63 }
 0x23f   : > { %548 = vst [vmem:[%s1738_s1] sm:$0x1] %v547_v0 }
 0x246   : > { %v1912_v1 = vld [vmem:[#allocation3 + $0x8] sm:$0xff]  ;;  %v1914_v3 = vld [vmem:[#allocation3] sm:$0xff]  ;;  %v1920_v57 = vld [vmem:[#allocation3 + $0x10] sm:$0xff] }
 0x247   : > { %580 = vrot.lane.b32.xlu1 %v1912_v1, %s1545_s20  ;;  %578 = vrot.lane.b32.xlu0 %v1914_v3, %s1545_s20  ;;  %v556_v5 = vrot.slane %v1920_v57, 7  ;;  %v561_v6 = vrot.slane %v1912_v1, 1  ;;  %v554_v7 = vrot.slane %v1914_v3, 7  ;;  %v560_v8 = vrot.slane %v1914_v3, 1 }
 0x248   : > { %v555_v13 = vrot.slane %v1912_v1, 7  ;;  %v562_v14 = vrot.slane %v1920_v57, 1  ;;  %v568_v18 = vrot.slane %v1920_v57, 6  ;;  %v573_v19 = vrot.slane %v1912_v1, 2 }
 0x249   : > { %v559_v11 = vsel %vm210_vm0, %v556_v5, %v554_v7  ;;  %v564_v12 = vsel %vm217_vm1, %v560_v8, %v561_v6  ;;  %v566_v20 = vrot.slane %v1914_v3, 6  ;;  %v572_v21 = vrot.slane %v1914_v3, 2 }
 0x24a   : > { %v605_v22 = vadd.f32 %v564_v12, %v559_v11  ;;  %v557_v26 = vsel %vm210_vm0, %v555_v13, %v556_v5  ;;  %v565_v27 = vsel %vm217_vm1, %v562_v14, %v560_v8  ;;  %v567_v28 = vrot.slane %v1912_v1, 6 }
 0x24b   : > { %584 = vrot.lane.b32.xlu1 %v1914_v3, %s1544_s19  ;;  %582 = vrot.lane.b32.xlu0 %v1920_v57, %s1545_s20  ;;  %v563_v31 = vsel %vm217_vm1, %v561_v6, %v562_v14  ;;  %v558_v32 = vsel %vm210_vm0, %v554_v7, %v555_v13  ;;  %v571_v36 = vsel %vm224_vm2, %v568_v18, %v566_v20  ;;  %v574_v39 = vrot.slane %v1920_v57, 2 }
 0x24c   : > { %v576_v38 = vsel %vm231_vm3, %v572_v21, %v573_v19  ;;  %v607_v40 = vadd.f32 %v565_v27, %v557_v26  ;;  %v606_v43 = vadd.f32 %v563_v31, %v558_v32  ;;  %v569_v44 = vsel %vm224_vm2, %v567_v28, %v568_v18 }
 0x24d   : > { %v620_v48 = vadd.f32 %v576_v38, %v571_v36  ;;  %v570_v50 = vsel %vm224_vm2, %v566_v20, %v567_v28  ;;  %v577_v54 = vsel %vm231_vm3, %v574_v39, %v572_v21  ;;  %v575_v55 = vsel %vm231_vm3, %v573_v19, %v574_v39 }
 0x24e   : > { %v602_v56 = vmul.f32 -5.0, %v1914_v3  ;;  %v638_v61 = vmul.f32 2.0, %v1914_v3  ;;  %v621_v5 = vadd.f32 %v575_v55, %v570_v50  ;;  %v603_v11 = vmul.f32 -5.0, %v1912_v1 }
 0x24f   : > { %588 = vrot.lane.b32.xlu1 %v1920_v57, %s1544_s19  ;;  %586 = vrot.lane.b32.xlu0 %v1912_v1, %s1544_s19  ;;  %v639_v18 = vmul.f32 2.0, %v1912_v1 }
 0x251   : > { %v642_v31 = vsub.f32 %v639_v18, %v1823_v23 }
 0x253   : > { %592 = vrot.lane.b32.xlu1 %v1912_v1, %s1546_s16  ;;  %590 = vrot.lane.b32.xlu0 %v1914_v3, %s1546_s16 }
 0x257   : > { %596 = vrot.lane.b32.xlu1 %v1914_v3, %s1547_s23  ;;  %594 = vrot.lane.b32.xlu0 %v1920_v57, %s1546_s16 }
 0x25b   : > { %600 = vrot.lane.b32.xlu1 %v1920_v57, %s1547_s23  ;;  %598 = vrot.lane.b32.xlu0 %v1912_v1, %s1547_s23 }
 0x2b9   : > { %v581_v59 = vpop.permute.xlu1 %580  ;;  %v579_v4 = vpop.permute.xlu0 %578 }
 0x2bd   : > { %v585_v9 = vpop.permute.xlu1 %584  ;;  %v583_v10 = vpop.permute.xlu0 %582 }
 0x2be   : > { %v608_v15 = vadd.f32 %v585_v9, %v579_v4 }
 0x2c0   : > { %v611_v29 = vadd.f32 %v608_v15, %v605_v22 }
 0x2c1   : > { %v589_v16 = vpop.permute.xlu1 %588  ;;  %v587_v17 = vpop.permute.xlu0 %586 }
 0x2c2   : > { %v610_v30 = vadd.f32 %v589_v16, %v583_v10  ;;  %v609_v35 = vadd.f32 %v587_v17, %v581_v59  ;;  %v614_v45 = vmul.f32 1.3333334, %v611_v29  ;;  %v622_v59 = vadd.f32 %v577_v54, %v569_v44  ;;  %v1990_v29 = vld [vmem:[%s1987_s21] sm:$0x1] }
 0x2c3   : > { %v604_v10 = vmul.f32 -5.0, %v1920_v57  ;;  %v641_v16 = vsub.f32 %v638_v61, %v1825_v24  ;;  %v640_v17 = vmul.f32 2.0, %v1920_v57 }
 0x2c4   : > { %v613_v46 = vadd.f32 %v610_v30, %v607_v40  ;;  %v612_v58 = vadd.f32 %v609_v35, %v606_v43  ;;  %v617_v62 = vadd.f32 %v614_v45, %v602_v56  ;;  %v658_v35 = vstv %s1262_s18 }
 0x2c5   : > { %v593_v33 = vpop.permute.xlu1 %592  ;;  %v591_v34 = vpop.permute.xlu0 %590  ;;  %v643_v24 = vsub.f32 %v640_v17, %v1831_v25  ;;  %v659_v36 = vmul.f32 %v658_v35, %v1734_v53 }
 0x2c6   : > { %v616_v63 = vmul.f32 1.3333334, %v613_v46  ;;  %v615_v6 = vmul.f32 1.3333334, %v612_v58 }
 0x2c8   : > { %v619_v15 = vadd.f32 %v616_v63, %v604_v10  ;;  %v618_v19 = vadd.f32 %v615_v6, %v603_v11 }
 0x2c9   : > { %v597_v47 = vpop.permute.xlu1 %596  ;;  %v595_v49 = vpop.permute.xlu0 %594 }
 0x2ca   : > { %v623_v52 = vadd.f32 %v597_v47, %v591_v34 }
 0x2cc   : > { %v626_v60 = vadd.f32 %v623_v52, %v620_v48 }
 0x2cd   : > { %v601_v0 = vpop.permute.xlu1 %600  ;;  %v599_v4 = vpop.permute.xlu0 %598 }
 0x2ce   : > { %v629_v7 = vmul.f32 -0.083333336, %v626_v60  ;;  %v625_v8 = vadd.f32 %v601_v0, %v595_v49  ;;  %v624_v9 = vadd.f32 %v599_v4, %v593_v33 }
 0x2d0   : > { %v632_v12 = vadd.f32 %v629_v7, %v617_v62  ;;  %v628_v13 = vadd.f32 %v625_v8, %v622_v59  ;;  %v627_v14 = vadd.f32 %v624_v9, %v621_v5 }
 0x2d2   : > { %v647_v20 = vmul.f32 %v632_v12, %v1726_v41  ;;  %v631_v21 = vmul.f32 -0.083333336, %v628_v13  ;;  %v630_v22 = vmul.f32 -0.083333336, %v627_v14 }
 0x2d4   : > { %v650_v26 = vadd.f32 %v647_v20, %v641_v16  ;;  %v634_v27 = vadd.f32 %v631_v21, %v619_v15  ;;  %v633_v28 = vadd.f32 %v630_v22, %v618_v19 }
 0x2d6   : > { %653 = vst [vmem:[#allocation2] sm:$0xff] %v650_v26  ;;  %v649_v30 = vmul.f32 %v634_v27, %v1724_v37  ;;  %v648_v32 = vmul.f32 %v633_v28, %v1728_v42 }
 0x2d8   : > { %v652_v33 = vadd.f32 %v649_v30, %v643_v24  ;;  %v651_v34 = vadd.f32 %v648_v32, %v642_v31 }
 0x2da   : > { %655 = vst [vmem:[#allocation2 + $0x10] sm:$0xff] %v652_v33  ;;  %654 = vst [vmem:[#allocation2 + $0x8] sm:$0xff] %v651_v34 }
 0x2e1   : > { %v656_v38 = vld [vmem:[%s1819_s2] sm:$0x1] }
 0x2e2   : > { %v660_v39 = vadd.f32 %v659_v36, %v656_v38 }
 0x2e4   : > { %661 = vst [vmem:[%s1819_s2] sm:$0x1] %v660_v39 }
 0x2eb   : > { %v1999_v40 = vld [vmem:[#allocation2 + $0x8] sm:$0xff]  ;;  %v2001_v43 = vld [vmem:[#allocation2] sm:$0xff]  ;;  %v2007_v23 = vld [vmem:[#allocation2 + $0x10] sm:$0xff] }
 0x2ec   : > { %693 = vrot.lane.b32.xlu1 %v1999_v40, %s1545_s20  ;;  %691 = vrot.lane.b32.xlu0 %v2001_v43, %s1545_s20  ;;  %v669_v45 = vrot.slane %v2007_v23, 7  ;;  %v674_v46 = vrot.slane %v1999_v40, 1  ;;  %v667_v47 = vrot.slane %v2001_v43, 7  ;;  %v673_v48 = vrot.slane %v2001_v43, 1 }
 0x2ed   : > { %v668_v54 = vrot.slane %v1999_v40, 7  ;;  %v675_v55 = vrot.slane %v2007_v23, 1  ;;  %v681_v62 = vrot.slane %v2007_v23, 6  ;;  %v686_v63 = vrot.slane %v1999_v40, 2 }
 0x2ee   : > { %v672_v58 = vsel %vm210_vm0, %v669_v45, %v667_v47  ;;  %v677_v52 = vsel %vm217_vm1, %v673_v48, %v674_v46  ;;  %v679_v0 = vrot.slane %v2001_v43, 6  ;;  %v685_v59 = vrot.slane %v2001_v43, 2 }
 0x2ef   : > { %v718_v4 = vadd.f32 %v677_v52, %v672_v58  ;;  %v670_v5 = vsel %vm210_vm0, %v668_v54, %v669_v45  ;;  %v678_v6 = vsel %vm217_vm1, %v675_v55, %v673_v48  ;;  %v680_v7 = vrot.slane %v1999_v40, 6 }
 0x2f0   : > { %697 = vrot.lane.b32.xlu1 %v2001_v43, %s1544_s19  ;;  %695 = vrot.lane.b32.xlu0 %v2007_v23, %s1545_s20  ;;  %v676_v10 = vsel %vm217_vm1, %v674_v46, %v675_v55  ;;  %v671_v11 = vsel %vm210_vm0, %v667_v47, %v668_v54  ;;  %v684_v15 = vsel %vm224_vm2, %v681_v62, %v679_v0  ;;  %v687_v17 = vrot.slane %v2007_v23, 2 }
 0x2f1   : > { %v689_v16 = vsel %vm231_vm3, %v685_v59, %v686_v63  ;;  %v720_v18 = vadd.f32 %v678_v6, %v670_v5  ;;  %v719_v19 = vadd.f32 %v676_v10, %v671_v11  ;;  %v682_v20 = vsel %vm224_vm2, %v680_v7, %v681_v62 }
 0x2f2   : > { %v733_v27 = vadd.f32 %v689_v16, %v684_v15  ;;  %v683_v24 = vsel %vm224_vm2, %v679_v0, %v680_v7  ;;  %v690_v32 = vsel %vm231_vm3, %v687_v17, %v685_v59  ;;  %v688_v33 = vsel %vm231_vm3, %v686_v63, %v687_v17 }
 0x2f3   : > { %v715_v34 = vmul.f32 -5.0, %v2001_v43  ;;  %v751_v36 = vmul.f32 2.0, %v2001_v43  ;;  %v734_v46 = vadd.f32 %v688_v33, %v683_v24  ;;  %v717_v58 = vmul.f32 -5.0, %v2007_v23 }
 0x2f4   : > { %701 = vrot.lane.b32.xlu1 %v2007_v23, %s1544_s19  ;;  %699 = vrot.lane.b32.xlu0 %v1999_v40, %s1544_s19  ;;  %v716_v52 = vmul.f32 -5.0, %v1999_v40  ;;  %v753_v62 = vmul.f32 2.0, %v2007_v23  ;;  %v752_v63 = vmul.f32 2.0, %v1999_v40 }
 0x2f6   : > { %v755_v11 = vsub.f32 %v752_v63, %v1912_v1 }
 0x2f8   : > { %705 = vrot.lane.b32.xlu1 %v1999_v40, %s1546_s16  ;;  %703 = vrot.lane.b32.xlu0 %v2001_v43, %s1546_s16 }
 0x2fc   : > { %709 = vrot.lane.b32.xlu1 %v2001_v43, %s1547_s23  ;;  %707 = vrot.lane.b32.xlu0 %v2007_v23, %s1546_s16 }
 0x300   : > { %713 = vrot.lane.b32.xlu1 %v2007_v23, %s1547_s23  ;;  %711 = vrot.lane.b32.xlu0 %v1999_v40, %s1547_s23 }
 0x35e   : > { %v694_v25 = vpop.permute.xlu1 %693  ;;  %v692_v44 = vpop.permute.xlu0 %691 }
 0x362   : > { %v698_v49 = vpop.permute.xlu1 %697  ;;  %v696_v50 = vpop.permute.xlu0 %695 }
 0x363   : > { %v721_v56 = vadd.f32 %v698_v49, %v692_v44  ;;  %v735_v44 = vadd.f32 %v690_v32, %v682_v20 }
 0x365   : > { %v724_v8 = vadd.f32 %v721_v56, %v718_v4 }
 0x366   : > { %v702_v60 = vpop.permute.xlu1 %701  ;;  %v700_v61 = vpop.permute.xlu0 %699 }
 0x367   : > { %v723_v9 = vadd.f32 %v702_v60, %v696_v50  ;;  %v722_v14 = vadd.f32 %v700_v61, %v694_v25  ;;  %v727_v21 = vmul.f32 1.3333334, %v724_v8  ;;  %v754_v61 = vsub.f32 %v751_v36, %v1914_v3 }
 0x368   : > { %v756_v3 = vsub.f32 %v753_v62, %v1920_v57 }
 0x369   : > { %v726_v22 = vadd.f32 %v723_v9, %v720_v18  ;;  %v725_v30 = vadd.f32 %v722_v14, %v719_v19  ;;  %v730_v38 = vadd.f32 %v727_v21, %v715_v34  ;;  %v2074_v9 = vld [vmem:[%s1900_s13] sm:$0x1]  ;;  %v771_v14 = vstv %s1263_s22 }
 0x36a   : > { %v706_v12 = vpop.permute.xlu1 %705  ;;  %v704_v13 = vpop.permute.xlu0 %703  ;;  %v772_v15 = vmul.f32 %v771_v14, %v1734_v53 }
 0x36b   : > { %v729_v39 = vmul.f32 1.3333334, %v726_v22  ;;  %v728_v47 = vmul.f32 1.3333334, %v725_v30 }
 0x36d   : > { %v732_v60 = vadd.f32 %v729_v39, %v717_v58  ;;  %v731_v0 = vadd.f32 %v728_v47, %v716_v52 }
 0x36e   : > { %v710_v26 = vpop.permute.xlu1 %709  ;;  %v708_v28 = vpop.permute.xlu0 %707 }
 0x36f   : > { %v736_v31 = vadd.f32 %v710_v26, %v704_v13 }
 0x371   : > { %v739_v35 = vadd.f32 %v736_v31, %v733_v27 }
 0x372   : > { %v714_v25 = vpop.permute.xlu1 %713  ;;  %v712_v45 = vpop.permute.xlu0 %711 }
 0x373   : > { %v742_v48 = vmul.f32 -0.083333336, %v739_v35  ;;  %v738_v49 = vadd.f32 %v714_v25, %v708_v28  ;;  %v737_v50 = vadd.f32 %v712_v45, %v706_v12 }
 0x375   : > { %v745_v54 = vadd.f32 %v742_v48, %v730_v38  ;;  %v741_v55 = vadd.f32 %v738_v49, %v735_v44  ;;  %v740_v56 = vadd.f32 %v737_v50, %v734_v46 }
 0x377   : > { %v760_v59 = vmul.f32 %v745_v54, %v1726_v41  ;;  %v744_v4 = vmul.f32 -0.083333336, %v741_v55  ;;  %v743_v5 = vmul.f32 -0.083333336, %v740_v56 }
 0x379   : > { %v763_v6 = vadd.f32 %v760_v59, %v754_v61  ;;  %v747_v7 = vadd.f32 %v744_v4, %v732_v60  ;;  %v746_v8 = vadd.f32 %v743_v5, %v731_v0 }
 0x37b   : > { %766 = vst [vmem:[#allocation3] sm:$0xff] %v763_v6  ;;  %v762_v10 = vmul.f32 %v747_v7, %v1724_v37  ;;  %v761_v12 = vmul.f32 %v746_v8, %v1728_v42 }
 0x37d   : > { %v765_v41 = vadd.f32 %v762_v10, %v756_v3  ;;  %v764_v13 = vadd.f32 %v761_v12, %v755_v11 }
 0x37f   : > { %768 = vst [vmem:[#allocation3 + $0x10] sm:$0xff] %v765_v41  ;;  %767 = vst [vmem:[#allocation3 + $0x8] sm:$0xff] %v764_v13 }
 0x386   : > { %v769_v16 = vld [vmem:[%s1738_s1] sm:$0x1] }
 0x387   : > { %v773_v17 = vadd.f32 %v772_v15, %v769_v16 }
 0x389   : > { %774 = vst [vmem:[%s1738_s1] sm:$0x1] %v773_v17 }
 0x390   : > { %v2083_v18 = vld [vmem:[#allocation3 + $0x8] sm:$0xff]  ;;  %v2085_v19 = vld [vmem:[#allocation3] sm:$0xff]  ;;  %v2091_v37 = vld [vmem:[#allocation3 + $0x10] sm:$0xff] }
 0x391   : > { %806 = vrot.lane.b32.xlu1 %v2083_v18, %s1545_s20  ;;  %804 = vrot.lane.b32.xlu0 %v2085_v19, %s1545_s20  ;;  %v782_v57 = vrot.slane %v2091_v37, 7  ;;  %v787_v20 = vrot.slane %v2083_v18, 1  ;;  %v780_v21 = vrot.slane %v2085_v19, 7  ;;  %v786_v22 = vrot.slane %v2085_v19, 1 }
 0x392   : > { %v781_v30 = vrot.slane %v2083_v18, 7  ;;  %v788_v31 = vrot.slane %v2091_v37, 1  ;;  %v794_v35 = vrot.slane %v2091_v37, 6  ;;  %v799_v36 = vrot.slane %v2083_v18, 2 }
 0x393   : > { %v785_v28 = vsel %vm210_vm0, %v782_v57, %v780_v21  ;;  %v790_v24 = vsel %vm217_vm1, %v786_v22, %v787_v20  ;;  %v792_v38 = vrot.slane %v2085_v19, 6  ;;  %v798_v39 = vrot.slane %v2085_v19, 2 }
 0x394   : > { %v831_v25 = vadd.f32 %v790_v24, %v785_v28  ;;  %v783_v44 = vsel %vm210_vm0, %v781_v30, %v782_v57  ;;  %v791_v45 = vsel %vm217_vm1, %v788_v31, %v786_v22  ;;  %v793_v46 = vrot.slane %v2083_v18, 6 }
 0x395   : > { %810 = vrot.lane.b32.xlu1 %v2085_v19, %s1544_s19  ;;  %808 = vrot.lane.b32.xlu0 %v2091_v37, %s1545_s20  ;;  %v789_v49 = vsel %vm217_vm1, %v787_v20, %v788_v31  ;;  %v784_v50 = vsel %vm210_vm0, %v780_v21, %v781_v30  ;;  %v797_v55 = vsel %vm224_vm2, %v794_v35, %v792_v38  ;;  %v800_v60 = vrot.slane %v2091_v37, 2 }
 0x396   : > { %v802_v56 = vsel %vm231_vm3, %v798_v39, %v799_v36  ;;  %v833_v61 = vadd.f32 %v791_v45, %v783_v44  ;;  %v832_v62 = vadd.f32 %v789_v49, %v784_v50  ;;  %v795_v63 = vsel %vm224_vm2, %v793_v46, %v794_v35  ;;  %v2159_v44 = vld [vmem:[#allocation8 + $0x10] sm:$0xff]  ;;  %v2161_v45 = vld [vmem:[#allocation8 + $0x8] sm:$0xff] }
 0x397   : > { %v846_v5 = vadd.f32 %v802_v56, %v797_v55  ;;  %v796_v7 = vsel %vm224_vm2, %v792_v38, %v793_v46  ;;  %v803_v10 = vsel %vm231_vm3, %v800_v60, %v798_v39  ;;  %v801_v11 = vsel %vm231_vm3, %v799_v36, %v800_v60 }
 0x398   : > { %v828_v12 = vmul.f32 -5.0, %v2085_v19  ;;  %v864_v13 = vmul.f32 2.0, %v2085_v19  ;;  %v848_v17 = vadd.f32 %v803_v10, %v795_v63  ;;  %v829_v28 = vmul.f32 -5.0, %v2083_v18 }
 0x399   : > { %814 = vrot.lane.b32.xlu1 %v2091_v37, %s1544_s19  ;;  %812 = vrot.lane.b32.xlu0 %v2083_v18, %s1544_s19  ;;  %v865_v35 = vmul.f32 2.0, %v2083_v18  ;;  %v884_v56 = vstv %s1264_s24 }
 0x39a   : > { %v885_v60 = vmul.f32 %v884_v56, %v1734_v53 }
 0x39d   : > { %818 = vrot.lane.b32.xlu1 %v2083_v18, %s1546_s16  ;;  %816 = vrot.lane.b32.xlu0 %v2085_v19, %s1546_s16 }
 0x3a1   : > { %822 = vrot.lane.b32.xlu1 %v2085_v19, %s1547_s23  ;;  %820 = vrot.lane.b32.xlu0 %v2091_v37, %s1546_s16 }
 0x3a5   : > { %826 = vrot.lane.b32.xlu1 %v2091_v37, %s1547_s23  ;;  %824 = vrot.lane.b32.xlu0 %v2083_v18, %s1547_s23 }
 0x403   : > { %v807_v42 = vpop.permute.xlu1 %806  ;;  %v805_v1 = vpop.permute.xlu0 %804 }
 0x407   : > { %v811_v26 = vpop.permute.xlu1 %810  ;;  %v809_v27 = vpop.permute.xlu0 %808 }
 0x408   : > { %v834_v32 = vadd.f32 %v811_v26, %v805_v1  ;;  %v847_v1 = vadd.f32 %v801_v11, %v796_v7  ;;  %v830_v26 = vmul.f32 -5.0, %v2091_v37 }
 0x40a   : > { %v837_v47 = vadd.f32 %v834_v32, %v831_v25 }
 0x40b   : > { %v815_v33 = vpop.permute.xlu1 %814  ;;  %v813_v34 = vpop.permute.xlu0 %812 }
 0x40c   : > { %v836_v48 = vadd.f32 %v815_v33, %v809_v27  ;;  %v835_v54 = vadd.f32 %v813_v34, %v807_v42  ;;  %v840_v0 = vmul.f32 1.3333334, %v837_v47  ;;  %v2152_v27 = vld [vmem:[#allocation8] sm:$0xff]  ;;  %v867_v33 = vsub.f32 %v864_v13, %v2001_v43  ;;  %v2164_v43 = vld [vmem:[%s1987_s21] sm:$0x1] }
 0x40d   : > { %v866_v34 = vmul.f32 2.0, %v2091_v37 }
 0x40e   : > { %v839_v59 = vadd.f32 %v836_v48, %v833_v61  ;;  %v838_v8 = vadd.f32 %v835_v54, %v832_v62  ;;  %v843_v14 = vadd.f32 %v840_v0, %v828_v12 }
 0x40f   : > { %v819_v58 = vpop.permute.xlu1 %818  ;;  %v817_v52 = vpop.permute.xlu0 %816  ;;  %v869_v49 = vsub.f32 %v866_v34, %v2007_v23 }
 0x410   : > { %v842_v15 = vmul.f32 1.3333334, %v839_v59  ;;  %v841_v57 = vmul.f32 1.3333334, %v838_v8 }
 0x412   : > { %v845_v32 = vadd.f32 %v842_v15, %v830_v26  ;;  %v844_v36 = vadd.f32 %v841_v57, %v829_v28 }
 0x413   : > { %v823_v4 = vpop.permute.xlu1 %822  ;;  %v821_v6 = vpop.permute.xlu0 %820 }
 0x414   : > { %v849_v3 = vadd.f32 %v823_v4, %v817_v52 }
 0x416   : > { %v852_v41 = vadd.f32 %v849_v3, %v846_v5 }
 0x417   : > { %v827_v16 = vpop.permute.xlu1 %826  ;;  %v825_v42 = vpop.permute.xlu0 %824 }
 0x418   : > { %v855_v20 = vmul.f32 -0.083333336, %v852_v41  ;;  %v851_v21 = vadd.f32 %v827_v16, %v821_v6  ;;  %v850_v22 = vadd.f32 %v825_v42, %v819_v58  ;;  %v868_v58 = vsub.f32 %v865_v35, %v1999_v40 }
 0x41a   : > { %v858_v24 = vadd.f32 %v855_v20, %v843_v14  ;;  %v854_v30 = vadd.f32 %v851_v21, %v848_v17  ;;  %v853_v31 = vadd.f32 %v850_v22, %v847_v1 }
 0x41c   : > { %v873_v38 = vmul.f32 %v2152_v27, %v858_v24  ;;  %v857_v39 = vmul.f32 -0.083333336, %v854_v30  ;;  %v856_v25 = vmul.f32 -0.083333336, %v853_v31 }
 0x41e   : > { %v876_v46 = vadd.f32 %v873_v38, %v867_v33  ;;  %v860_v47 = vadd.f32 %v857_v39, %v845_v32  ;;  %v859_v48 = vadd.f32 %v856_v25, %v844_v36 }
 0x420   : > { %879 = vst [vmem:[#allocation2] sm:$0xff] %v876_v46  ;;  %v875_v50 = vmul.f32 %v2159_v44, %v860_v47  ;;  %v874_v52 = vmul.f32 %v2161_v45, %v859_v48 }
 0x422   : > { %v878_v54 = vadd.f32 %v875_v50, %v869_v49  ;;  %v877_v55 = vadd.f32 %v874_v52, %v868_v58 }
 0x424   : > { %881 = vst [vmem:[#allocation2 + $0x10] sm:$0xff] %v878_v54  ;;  %880 = vst [vmem:[#allocation2 + $0x8] sm:$0xff] %v877_v55 }
 0x42b   : > { %v882_v61 = vld [vmem:[%s1819_s2] sm:$0x1] }
 0x42c   : > { %v886_v62 = vadd.f32 %v885_v60, %v882_v61 }
 0x42e   : > { %887 = vst [vmem:[%s1819_s2] sm:$0x1] %v886_v62 }
 0x435   : > { %v2173_v63 = vld [vmem:[#allocation2 + $0x8] sm:$0xff]  ;;  %v2175_v0 = vld [vmem:[#allocation2] sm:$0xff]  ;;  %v2181_v40 = vld [vmem:[#allocation2 + $0x10] sm:$0xff] }
 0x436   : > { %919 = vrot.lane.b32.xlu1 %v2173_v63, %s1545_s20  ;;  %917 = vrot.lane.b32.xlu0 %v2175_v0, %s1545_s20  ;;  %v895_v4 = vrot.slane %v2181_v40, 7  ;;  %v900_v5 = vrot.slane %v2173_v63, 1  ;;  %v893_v6 = vrot.slane %v2175_v0, 7  ;;  %v899_v7 = vrot.slane %v2175_v0, 1 }
 0x437   : > { %v894_v12 = vrot.slane %v2173_v63, 7  ;;  %v901_v41 = vrot.slane %v2181_v40, 1  ;;  %v907_v16 = vrot.slane %v2181_v40, 6  ;;  %v912_v17 = vrot.slane %v2173_v63, 2 }
 0x438   : > { %v898_v10 = vsel %vm210_vm0, %v895_v4, %v893_v6  ;;  %v903_v11 = vsel %vm217_vm1, %v899_v7, %v900_v5  ;;  %v905_v42 = vrot.slane %v2175_v0, 6  ;;  %v911_v1 = vrot.slane %v2175_v0, 2 }
 0x439   : > { %v944_v57 = vadd.f32 %v903_v11, %v898_v10  ;;  %v896_v20 = vsel %vm210_vm0, %v894_v12, %v895_v4  ;;  %v904_v21 = vsel %vm217_vm1, %v901_v41, %v899_v7  ;;  %v906_v22 = vrot.slane %v2173_v63, 6 }
 0x43a   : > { %923 = vrot.lane.b32.xlu1 %v2175_v0, %s1544_s19  ;;  %921 = vrot.lane.b32.xlu0 %v2181_v40, %s1545_s20  ;;  %v902_v24 = vsel %vm217_vm1, %v900_v5, %v901_v41  ;;  %v897_v30 = vsel %vm210_vm0, %v893_v6, %v894_v12  ;;  %v910_v34 = vsel %vm224_vm2, %v907_v16, %v905_v42  ;;  %v913_v36 = vrot.slane %v2181_v40, 2 }
 0x43b   : > { %v915_v35 = vsel %vm231_vm3, %v911_v1, %v912_v17  ;;  %v946_v38 = vadd.f32 %v904_v21, %v896_v20  ;;  %v945_v39 = vadd.f32 %v902_v24, %v897_v30  ;;  %v908_v25 = vsel %vm224_vm2, %v906_v22, %v907_v16  ;;  %v2248_v30 = vld [vmem:[%s1900_s13] sm:$0x1] }
 0x43c   : > { %v959_v49 = vadd.f32 %v915_v35, %v910_v34  ;;  %v909_v58 = vsel %vm224_vm2, %v905_v42, %v906_v22  ;;  %v916_v55 = vsel %vm231_vm3, %v913_v36, %v911_v1  ;;  %v914_v56 = vsel %vm231_vm3, %v912_v17, %v913_v36 }
 0x43d   : > { %v941_v60 = vmul.f32 -5.0, %v2175_v0  ;;  %v977_v62 = vmul.f32 2.0, %v2175_v0  ;;  %v961_v5 = vadd.f32 %v916_v55, %v908_v25  ;;  %v960_v7 = vadd.f32 %v914_v56, %v909_v58 }
 0x43e   : > { %927 = vrot.lane.b32.xlu1 %v2181_v40, %s1544_s19  ;;  %925 = vrot.lane.b32.xlu0 %v2173_v63, %s1544_s19  ;;  %v943_v12 = vmul.f32 -5.0, %v2181_v40  ;;  %v942_v41 = vmul.f32 -5.0, %v2173_v63  ;;  %v979_v42 = vmul.f32 2.0, %v2181_v40  ;;  %v978_v1 = vmul.f32 2.0, %v2173_v63 }
 0x43f   : > { %v980_v17 = vsub.f32 %v977_v62, %v2085_v19  ;;  %v997_v36 = vstv %s1265_s17 }
 0x440   : > { %v982_v19 = vsub.f32 %v979_v42, %v2091_v37 }
 0x442   : > { %931 = vrot.lane.b32.xlu1 %v2173_v63, %s1546_s16  ;;  %929 = vrot.lane.b32.xlu0 %v2175_v0, %s1546_s16 }
 0x446   : > { %935 = vrot.lane.b32.xlu1 %v2175_v0, %s1547_s23  ;;  %933 = vrot.lane.b32.xlu0 %v2181_v40, %s1546_s16 }
 0x44a   : > { %939 = vrot.lane.b32.xlu1 %v2181_v40, %s1547_s23  ;;  %937 = vrot.lane.b32.xlu0 %v2173_v63, %s1547_s23 }
 0x4a8   : > { %v920_v23 = vpop.permute.xlu1 %919  ;;  %v918_v59 = vpop.permute.xlu0 %917 }
 0x4ac   : > { %v924_v8 = vpop.permute.xlu1 %923  ;;  %v922_v3 = vpop.permute.xlu0 %921 }
 0x4ad   : > { %v947_v13 = vadd.f32 %v924_v8, %v918_v59 }
 0x4af   : > { %v950_v26 = vadd.f32 %v947_v13, %v944_v57 }
 0x4b0   : > { %v928_v14 = vpop.permute.xlu1 %927  ;;  %v926_v15 = vpop.permute.xlu0 %925 }
 0x4b1   : > { %v949_v28 = vadd.f32 %v928_v14, %v922_v3  ;;  %v948_v33 = vadd.f32 %v926_v15, %v920_v23  ;;  %v953_v46 = vmul.f32 1.3333334, %v950_v26 }
 0x4b3   : > { %v952_v47 = vadd.f32 %v949_v28, %v946_v38  ;;  %v951_v52 = vadd.f32 %v948_v33, %v945_v39  ;;  %v956_v23 = vadd.f32 %v953_v46, %v941_v60  ;;  %v998_v38 = vmul.f32 %v997_v36, %v1734_v53 }
 0x4b4   : > { %v932_v31 = vpop.permute.xlu1 %931  ;;  %v930_v32 = vpop.permute.xlu0 %929 }
 0x4b5   : > { %v955_v59 = vmul.f32 1.3333334, %v952_v47  ;;  %v954_v8 = vmul.f32 1.3333334, %v951_v52 }
 0x4b7   : > { %v958_v16 = vadd.f32 %v955_v59, %v943_v12  ;;  %v957_v57 = vadd.f32 %v954_v8, %v942_v41 }
 0x4b8   : > { %v936_v48 = vpop.permute.xlu1 %935  ;;  %v934_v50 = vpop.permute.xlu0 %933 }
 0x4b9   : > { %v962_v54 = vadd.f32 %v936_v48, %v930_v32  ;;  %v981_v32 = vsub.f32 %v978_v1, %v2083_v18 }
 0x4bb   : > { %v965_v61 = vadd.f32 %v962_v54, %v959_v49 }
 0x4bc   : > { %v940_v4 = vpop.permute.xlu1 %939  ;;  %v938_v6 = vpop.permute.xlu0 %937 }
 0x4bd   : > { %v968_v3 = vmul.f32 -0.083333336, %v965_v61  ;;  %v964_v10 = vadd.f32 %v940_v4, %v934_v50  ;;  %v963_v11 = vadd.f32 %v938_v6, %v932_v31 }
 0x4bf   : > { %v971_v13 = vadd.f32 %v968_v3, %v956_v23  ;;  %v967_v14 = vadd.f32 %v964_v10, %v961_v5  ;;  %v966_v15 = vadd.f32 %v963_v11, %v960_v7 }
 0x4c1   : > { %v986_v20 = vmul.f32 %v971_v13, %v2152_v27  ;;  %v970_v21 = vmul.f32 -0.083333336, %v967_v14  ;;  %v969_v22 = vmul.f32 -0.083333336, %v966_v15 }
 0x4c3   : > { %v989_v26 = vadd.f32 %v986_v20, %v980_v17  ;;  %v973_v28 = vadd.f32 %v970_v21, %v958_v16  ;;  %v972_v24 = vadd.f32 %v969_v22, %v957_v57 }
 0x4c5   : > { %992 = vst [vmem:[#allocation3] sm:$0xff] %v989_v26  ;;  %v988_v31 = vmul.f32 %v973_v28, %v2159_v44  ;;  %v987_v33 = vmul.f32 %v972_v24, %v2161_v45 }
 0x4c7   : > { %v991_v34 = vadd.f32 %v988_v31, %v982_v19  ;;  %v990_v35 = vadd.f32 %v987_v33, %v981_v32 }
 0x4c9   : > { %994 = vst [vmem:[#allocation3 + $0x10] sm:$0xff] %v991_v34  ;;  %993 = vst [vmem:[#allocation3 + $0x8] sm:$0xff] %v990_v35 }
 0x4d0   : > { %v995_v39 = vld [vmem:[%s1738_s1] sm:$0x1] }
 0x4d1   : > { %v999_v25 = vadd.f32 %v998_v38, %v995_v39 }
 0x4d3   : > { %1000 = vst [vmem:[%s1738_s1] sm:$0x1] %v999_v25 }
 0x4da   : > { %v2257_v46 = vld [vmem:[#allocation3 + $0x8] sm:$0xff]  ;;  %v2259_v47 = vld [vmem:[#allocation3] sm:$0xff]  ;;  %v2261_v37 = vld [vmem:[#allocation3 + $0x10] sm:$0xff] }
 0x4db   : > { %1032 = vrot.lane.b32.xlu1 %v2257_v46, %s1545_s20  ;;  %1030 = vrot.lane.b32.xlu0 %v2259_v47, %s1545_s20  ;;  %v1008_v18 = vrot.slane %v2261_v37, 7  ;;  %v1013_v48 = vrot.slane %v2257_v46, 1  ;;  %v1006_v49 = vrot.slane %v2259_v47, 7  ;;  %v1012_v50 = vrot.slane %v2259_v47, 1 }
 0x4dc   : > { %v1007_v58 = vrot.slane %v2257_v46, 7  ;;  %v1014_v52 = vrot.slane %v2261_v37, 1  ;;  %v1020_v56 = vrot.slane %v2261_v37, 6  ;;  %v1025_v5 = vrot.slane %v2257_v46, 2 }
 0x4dd   : > { %v1011_v54 = vsel %vm210_vm0, %v1008_v18, %v1006_v49  ;;  %v1016_v55 = vsel %vm217_vm1, %v1012_v50, %v1013_v48  ;;  %v1018_v6 = vrot.slane %v2259_v47, 6  ;;  %v1024_v8 = vrot.slane %v2259_v47, 2 }
 0x4de   : > { %v1057_v60 = vadd.f32 %v1016_v55, %v1011_v54  ;;  %v1009_v61 = vsel %vm210_vm0, %v1007_v58, %v1008_v18  ;;  %v1017_v62 = vsel %vm217_vm1, %v1014_v52, %v1012_v50  ;;  %v1015_v23 = vsel %vm217_vm1, %v1013_v48, %v1014_v52 }
 0x4df   : > { %1036 = vrot.lane.b32.xlu1 %v2259_v47, %s1544_s19  ;;  %1034 = vrot.lane.b32.xlu0 %v2261_v37, %s1545_s20  ;;  %v1059_v59 = vadd.f32 %v1017_v62, %v1009_v61  ;;  %v1010_v4 = vsel %vm210_vm0, %v1006_v49, %v1007_v58  ;;  %v1019_v3 = vrot.slane %v2257_v46, 6  ;;  %v1023_v10 = vsel %vm224_vm2, %v1020_v56, %v1018_v6  ;;  %s176_s20 = sand.u32 1, %s1519_s29  }
 0x4e0   : > { %v1058_v7 = vadd.f32 %v1015_v23, %v1010_v4  ;;  %v1026_v11 = vrot.slane %v2261_v37, 2  ;;  %v1028_v12 = vsel %vm231_vm3, %v1024_v8, %v1025_v5  ;;  %v1054_v24 = vmul.f32 -5.0, %v2259_v47 }
 0x4e1   : > { %v1021_v41 = vsel %vm224_vm2, %v1019_v3, %v1020_v56  ;;  %v1022_v13 = vsel %vm224_vm2, %v1018_v6, %v1019_v3  ;;  %v1072_v14 = vadd.f32 %v1028_v12, %v1023_v10  ;;  %v1056_v39 = vmul.f32 -5.0, %v2261_v37 }
 0x4e2   : > { %v1029_v15 = vsel %vm231_vm3, %v1026_v11, %v1024_v8  ;;  %v1027_v17 = vsel %vm231_vm3, %v1025_v5, %v1026_v11  ;;  %v1055_v18 = vmul.f32 -5.0, %v2257_v46  ;;  %v1090_v62 = vmul.f32 2.0, %v2259_v47 }
 0x4e3   : > { %1040 = vrot.lane.b32.xlu1 %v2261_v37, %s1544_s19  ;;  %1038 = vrot.lane.b32.xlu0 %v2257_v46, %s1544_s19  ;;  %v1074_v16 = vadd.f32 %v1029_v15, %v1021_v41  ;;  %v1073_v42 = vadd.f32 %v1027_v17, %v1022_v13  ;;  %v1091_v8 = vmul.f32 2.0, %v2257_v46  ;;  %s1266_s19 = sld [smem:[#allocation12 + $0x7]] }
 0x4e4   : > { %v1093_v3 = vsub.f32 %v1090_v62, %v2175_v0 }
 0x4e7   : > { %1044 = vrot.lane.b32.xlu1 %v2257_v46, %s1546_s16  ;;  %1042 = vrot.lane.b32.xlu0 %v2259_v47, %s1546_s16 }
 0x4e9   : > { %v1110_v17 = vstv %s1266_s19 }
 0x4eb   : > { %1048 = vrot.lane.b32.xlu1 %v2259_v47, %s1547_s23  ;;  %1046 = vrot.lane.b32.xlu0 %v2261_v37, %s1546_s16  ;;  %s2341_s16 = sshll.u32 %s176_s20, 3 }
 0x4ec   : > { %s178_s25 = scalar_lea.vmem [#allocation13], %s2341_s16 }
 0x4ed   : > { %s1166_s26 = sshll.u32 %s178_s25, 4  ;;  %s2358_s26 = int_to_ptr.vmem [resolvable:$true] %s1166_s26 }
 0x4ee   : > { %p1454_p8 = scmp.lt.s32.totalorder %s2358_s26, %s1452_s11 }
 0x4ef   : > { %1052 = vrot.lane.b32.xlu1 %v2261_v37, %s1547_s23  ;;  %1050 = vrot.lane.b32.xlu0 %v2257_v46, %s1547_s23  ;;  %v1094_v46 = vsub.f32 %v1091_v8, %v2173_v63  ;;  %v1001_v63 = vld [vmem:[%s1900_s13] sm:$0x1]  ;;  %s1268_s23 = sshll.u32 %s1527_s6, 7  ;;  %s1152_s6 = scalar_lea.sflag [#allocation10], %s176_s20 }
 0x4f0   : > { %s2356_s27 = scalar_lea.hbm %s2408_s5, %s1268_s23  ;;  %s1453_s13 = scalar_lea.vmem %s1452_s11, 256 }
 0x54d   : > { %v1033_v2 = vpop.permute.xlu1 %1032  ;;  %v1031_v1 = vpop.permute.xlu0 %1030 }
 0x551   : > { %v1037_v57 = vpop.permute.xlu1 %1036  ;;  %v1035_v20 = vpop.permute.xlu0 %1034 }
 0x552   : > { %v1060_v21 = vadd.f32 %v1037_v57, %v1031_v1 }
 0x554   : > { %v1063_v22 = vadd.f32 %v1060_v21, %v1057_v60  ;;  %v1131_v21 = vrot.slane %v1001_v63, 2 }
 0x555   : > { %v1041_v26 = vpop.permute.xlu1 %1040  ;;  %v1039_v28 = vpop.permute.xlu0 %1038 }
 0x556   : > { %v1066_v19 = vmul.f32 1.3333334, %v1063_v22  ;;  %v1062_v31 = vadd.f32 %v1041_v26, %v1035_v20  ;;  %v1061_v32 = vadd.f32 %v1039_v28, %v1033_v2 }
 0x558   : > { %v1069_v33 = vadd.f32 %v1066_v19, %v1054_v24  ;;  %v1065_v34 = vadd.f32 %v1062_v31, %v1059_v59  ;;  %v1064_v35 = vadd.f32 %v1061_v32, %v1058_v7  ;;  %v1092_v7 = vmul.f32 2.0, %v2261_v37 }
 0x559   : > { %v1045_v36 = vpop.permute.xlu1 %1044  ;;  %v1043_v38 = vpop.permute.xlu0 %1042 }
 0x55a   : > { %v1068_v25 = vmul.f32 1.3333334, %v1065_v34  ;;  %v1067_v48 = vmul.f32 1.3333334, %v1064_v35  ;;  %v1095_v15 = vsub.f32 %v1092_v7, %v2181_v40  ;;  %v1122_v40 = vrot.slane %v2164_v43, 5 }
 0x55c   : > { %v1071_v49 = vadd.f32 %v1068_v25, %v1056_v39  ;;  %v1070_v50 = vadd.f32 %v1067_v48, %v1055_v18 }
 0x55d   : > { %v1049_v58 = vpop.permute.xlu1 %1048  ;;  %v1047_v52 = vpop.permute.xlu0 %1046 }
 0x55e   : > { %v1075_v54 = vadd.f32 %v1049_v58, %v1043_v38 }
 0x560   : > { %v1078_v55 = vadd.f32 %v1075_v54, %v1072_v14  ;;  %v888_v14 = vld [vmem:[%s1987_s21] sm:$0x1] }
 0x561   : > { %v1053_v56 = vpop.permute.xlu1 %1052  ;;  %v1051_v60 = vpop.permute.xlu0 %1050  ;;  %v1128_v57 = vrot.slane %v888_v14, 3 }
 0x562   : > { %v1081_v61 = vmul.f32 -0.083333336, %v1078_v55  ;;  %v1077_v23 = vadd.f32 %v1053_v56, %v1047_v52  ;;  %v1076_v59 = vadd.f32 %v1051_v60, %v1045_v36 }
 0x564   : > { %v1084_v4 = vadd.f32 %v1081_v61, %v1069_v33  ;;  %v1080_v5 = vadd.f32 %v1077_v23, %v1074_v16  ;;  %v1079_v6 = vadd.f32 %v1076_v59, %v1073_v42  ;;  %v1111_v42 = vmul.f32 %v1110_v17, %v1734_v53 }
 0x565   : > { %v1125_v53 = vrot.slane %v2248_v30, 4 }
 0x566   : > { %v1099_v10 = vmul.f32 %v1084_v4, %v2152_v27  ;;  %v1083_v11 = vmul.f32 -0.083333336, %v1080_v5  ;;  %v1082_v12 = vmul.f32 -0.083333336, %v1079_v6 }
 0x568   : > { %v1102_v41 = vadd.f32 %v1099_v10, %v1093_v3  ;;  %v1086_v47 = vadd.f32 %v1083_v11, %v1071_v49  ;;  %v1085_v13 = vadd.f32 %v1082_v12, %v1070_v50 }
 0x56a   : > { %v1101_v37 = vmul.f32 %v1086_v47, %v2159_v44  ;;  %v1100_v0 = vmul.f32 %v1085_v13, %v2161_v45  ;;  %1105 = vst [vmem:[#allocation2] sm:$0xff] %v1102_v41  ;;  %v1116_v44 = vrot.slane %v1990_v29, 7  ;;  %v1119_v45 = vrot.slane %v2074_v9, 6 }
 0x56c   : > { %v1104_v27 = vadd.f32 %v1101_v37, %v1095_v15  ;;  %v1103_v16 = vadd.f32 %v1100_v0, %v1094_v46  ;;  %v1137_v20 = vsel %vm1136_vm5, %v1903_v51, %v1116_v44 }
 0x56d   : > { %v1139_v22 = vsel %vm1138_vm6, %v1137_v20, %v1119_v45 }
 0x56e   : > { %1106 = vst [vmem:[#allocation2 + $0x8] sm:$0xff] %v1103_v16  ;;  %1107 = vst [vmem:[#allocation2 + $0x10] sm:$0xff] %v1104_v27  ;;  %v1141_v29 = vsel %vm1140_vm7, %v1139_v22, %v1122_v40 }
 0x56f   : > { %v1143_v43 = vsel %vm1142_vm8, %v1141_v29, %v1125_v53 }
 0x570   : > { %v1145_v30 = vsel %vm1144_vm9, %v1143_v43, %v1128_v57 }
 0x571   : > { %v1147_v28 = vsel %vm1146_vm10, %v1145_v30, %v1131_v21 }
 0x575   : > { %v1108_v2 = vld [vmem:[%s1819_s2] sm:$0x1] }
 0x576   : > { %v1112_v1 = vadd.f32 %v1111_v42, %v1108_v2 }
 0x578   : > { %1113 = vst [vmem:[%s1819_s2] sm:$0x1] %v1112_v1  ;;  %s1447_s2 = scalar_lea.vmem %s2358_s26, 128 }
 0x579   : > { %p1448_p9 = scmp.ne.s32.totalorder %s2358_s26, %s1447_s2  ;;  %p1455_p10 = scmp.lt.s32.totalorder %s1453_s13, %s1447_s2 }
 0x57b   : > { %p1449_p3 = pnand %p1448_p9, %p2422_p11  ;;  %p1456_p12 = por %p1455_p10, %p1454_p8 }
 0x57d   : > { %p1450_p5 = pneg %p1449_p3 }
 0x57f   : > { %v1114_v9 = vld [vmem:[%s1987_s21] sm:$0x1]  ;;  %p1457_p0 = pnand %p1456_p12, %p1450_p5 }
 0x580   : > { %v1134_v26 = vrot.slane %v1114_v9, 1 }
 0x582   : > { %v1149_v51 = vsel %vm1148_vm11, %v1147_v28, %v1134_v26 }
 0x583   : > { %1150 = vst [vmem:[%s178_s25] sm:$0xff] %v1149_v51 }
 0x584   : > { %1460 = shalt.err (!%p1457_p0)
}
 0x585   : > { %s1461_s18 = scalar_lea.hbm %s2356_s27, 128  ;;  %s1465_s24 = scalar_lea.hbm %s2408_s5, 256 }
 0x586   : > { %p1462_p4 = scmp.ne.s32.totalorder %s2356_s27, %s1461_s18  ;;  %p1466_p13 = scmp.lt.u32.totalorder %s2356_s27, %s2408_s5 }
 0x587   : > { %p1467_p1 = scmp.lt.u32.totalorder %s1465_s24, %s1461_s18  ;;  %p1469_p9 = scmp.lt.u32.totalorder %s1461_s18, %s2356_s27 }
 0x588   : > { %p1463_p6 = pnand %p1462_p4, %p2422_p11 }
 0x589   : > { %p1468_p2 = por %p1467_p1, %p1466_p13 }
 0x58a   : > { %p1464_p7 = pneg %p1463_p6 }
 0x58b   : > { %p1470_p3 = por %p1469_p9, %p1468_p2 }
 0x58d   : > { %p1471_p5 = pnand %p1470_p3, %p1464_p7 }
 0x58f   : > { %1474 = shalt.err (!%p1471_p5)
}
 0x590   : > { %1279 = dma.vmem_to_hbm [thread:$0]  (%p2422_p11), %s2358_s26, 128, %s2356_s27, %s1152_s6  }
 0x591 PF: > { %p1296_p8 = scmp.ge.s32.totalorder %s1535_s8, 2  ;;  %s1178_s20 = sand.u32 1, %s1515_s28  }
 0x592   : > { %p2423_p10 = scmp.ne.s32.totalorder %s2416_s14, 0  ;;  %s1179_s16 = scalar_lea.sflag [#allocation10], %s1178_s20 }
 0x594   : > { %p1289_p12 = pnand %p1296_p8, %p2423_p10 }
 0x596   : > { %1510 = dma.done.wait (!%p1289_p12), %s1179_s16, 128  }
 0x597   : > { %1512 = vsyncadd (!%p1289_p12), %s1179_s16, 4294967168  ;;  %s31_s8 = sadd.s32 1, %s1535_s8   ;;  %s2424_s28 = smov %s1519_s29 }
 0x598   : > { %p28_p0 = scmp.ge.s32.totalorder %s31_s8, 4   ;;  %s2425_s29 = smov %s1523_s30 }
 0x599   : > { %s2426_s30 = smov %s1641_s15  ;;  %s2427_s6 = smov %s1531_s7 }
 0x59a   : > { %s2428_s7 = smov %s2430_s10  ;;  %30 = sbr.rel (!%p28_p0) target bundleno = 31 (0x1f), region = 79 }
 0x5a1   :  { %1184 = vsyncpa [#allocation9], 1 }
 0x5a2   :  { %1186 = vsyncpa [#allocation9 + $0x1], 1 }
 0x5a3   :  { %1187 = vsyncpa [#allocation10], 1 }
 0x5a4   :  { %1189 = vsyncpa [#allocation10 + $0x1], 1 }
 0x5a5   :  { %1190 = vsyncpa [#allocation11], 1 }
 0x5a6   :  { %1192 = vsyncpa [#allocation11 + $0x1], 1 }

</bundles_post_ra>
